<compile_context>
chip_gen: v6e
topology: v6e:2x2x1
jax: 0.10.0
libtpu: 0.0.40
codegen_flags: <defaults>
</compile_context>

<pallas_src>
import numpy as np
import jax
import jax.numpy as jnp
from jax.experimental import pallas as pl
from jax.experimental.pallas import tpu as pltpu


# ----------------------------- Pallas kernel ------------------------------ #
def _lstm_kernel(x_ref, state_ref, w_ref, bh_ref, out_ref):
    # x_ref:     (T*B, D)          time-major rows, batch padded to a sublane tile
    # state_ref: (2L, B, H)        rows 0..L-1 = h0, rows L..2L-1 = c0
    # w_ref:     (D + H + (L-1)*2H, 4H)  packed, lane-dense weight slab:
    #              [ w_ih0 (D,4H) | w_hh0 (H,4H) | [w_ih_l ; w_hh_l] (2H,4H) per upper layer ]
    #            gate order along 4H is i | f | o | g
    # bh_ref:    (L+1, 4H)         rows 0..L-1 = per-layer combined bias (b_ih + b_hh)
    #                              row L      = [ w_fc (H lanes) | b_fc | 0 ... ]
    # out_ref:   (B, 128)          lane-dense output; column 0 carries the result
    L2, B, H = state_ref.shape
    L = L2 // 2
    TB, D = x_ref.shape
    T = TB // B
    H4 = 4 * H

    # ---- static, sublane-aligned row slices into the packed weight slab ----
    w_in0 = w_ref[0:D, :]                                    # (D, 4H)
    w_hh0 = w_ref[D:D + H, :]                                # (H, 4H)
    base = D + H
    w_up = [w_ref[base + l * 2 * H: base + (l + 1) * 2 * H, :]  # (2H, 4H)
            for l in range(L - 1)]

    # ---- hoisted layer-0 input projection over ALL timesteps (one GEMM) ----
    # (T*B, D) @ (D, 4H) + (1, 4H); layer-0 combined bias folded in here.
    x_pre = (jnp.dot(x_ref[...], w_in0, preferred_element_type=jnp.float32)
             + bh_ref[0:1, :])

    # ---- hoisted upper-layer bias broadcasts (JAX does not CSE broadcast) ----
    b_up = [jnp.broadcast_to(bh_ref[l + 1:l + 2, :], (B, H4)) for l in range(L - 1)]

    hs = [state_ref[l] for l in range(L)]
    cs = [state_ref[L + l] for l in range(L)]

    def cell(pre, c_prev):
        # Full-vreg EUP passes on the fused i|f|o|g pre-activation, gate slices after.
        sig = jax.nn.sigmoid(pre)
        tnh = jnp.tanh(pre)
        i_g = sig[:, 0:H]
        f_g = sig[:, H:2 * H]
        o_g = sig[:, 2 * H:3 * H]
        g_g = tnh[:, 3 * H:4 * H]
        c_new = f_g * c_prev + i_g * g_g
        h_new = o_g * jnp.tanh(c_new)
        return h_new, c_new

    for t in range(T):                                       # static unroll (T small)
        # layer 0: only the recurrent matmul remains on the serial path
        pre0 = (x_pre[t * B:(t + 1) * B, :]
                + jnp.dot(hs[0], w_hh0, preferred_element_type=jnp.float32))
        hs[0], cs[0] = cell(pre0, cs[0])
        # layers 1..L-1: single fused (B,2H) x (2H,4H) matmul per cell
        for l in range(1, L):
            lhs = jnp.concatenate([hs[l - 1], hs[l]], axis=-1)        # (B, 2H)
            pre = (jnp.dot(lhs, w_up[l - 1], preferred_element_type=jnp.float32)
                   + b_up[l - 1])
            hs[l], cs[l] = cell(pre, cs[l])

    # ---- lane-dense fc head: VPU multiply + XLU lane-reduce (no N=1 MXU op,
    #      no masked (B,1) store). Column 0 of out_ref holds the result. ----
    w_fc = bh_ref[L:L + 1, 0:H]                              # (1, H)
    b_fc = bh_ref[L:L + 1, H:H + 1]                          # (1, 1)
    out_col = jnp.sum(hs[L - 1] * w_fc, axis=-1, keepdims=True) + b_fc   # (B, 1)
    out_ref[...] = jnp.broadcast_to(out_col, out_ref.shape)


# ------------------------------ JAX wrapper -------------------------------- #
def net_lstm2_forward(x_padded, h0, c0, params):
    T, B, D = x_padded.shape
    L, _, H = h0.shape
    # Gate-slice offsets assume a sublane/lane friendly H (module default 30
    # should be padded to 32 so 4H is exactly one 128-lane vreg row).
    assert H % 8 == 0, "num_nodes must be a multiple of 8 (pad 30 -> 32)"

    # Pad the batch up to a full sublane tile (multiple of 8): unmasked vector
    # ops; padded rows are independent and sliced off below.
    B_pad = max(8, ((B + 7) // 8) * 8)
    if B_pad != B:
        x_padded = jnp.pad(x_padded, ((0, 0), (0, B_pad - B), (0, 0)))
        h0 = jnp.pad(h0, ((0, 0), (0, B_pad - B), (0, 0)))
        c0 = jnp.pad(c0, ((0, 0), (0, B_pad - B), (0, 0)))

    # Time-major flatten so the hoisted layer-0 projection is one big GEMM.
    x_flat = x_padded.reshape(T * B_pad, D)

    # Stack h0/c0 into one operand (one DMA instead of two).
    state0 = jnp.concatenate([h0, c0], axis=0)                       # (2L, B_pad, H)

    # Packed weight slab: layer-0 input, layer-0 recurrent, then for each upper
    # layer the stacked [w_ih ; w_hh] fused RHS (enables the single-dot cell).
    w_up = [jnp.concatenate([params["w_ihr"][l], params["w_hhr"][l]], axis=0)
            for l in range(L - 1)]
    w_slab = jnp.concatenate([params["w_ih0"], params["w_hh0"]] + w_up, axis=0)

    # Packed biases + fc head: rows 0..L-1 biases, row L = [w_fc | b_fc | 0...].
    head = jnp.zeros((1, 4 * H), jnp.float32)
    head = head.at[0, :H].set(params["w_fc"][:, 0])
    head = head.at[0, H].set(params["b_fc"][0, 0])
    bh = jnp.concatenate([params["b0"],
                          params["br"].reshape(L - 1, 4 * H),
                          head], axis=0)                             # (L+1, 4H)

    vmem = pl.BlockSpec(memory_space=pltpu.MemorySpace.VMEM)
    out = pl.pallas_call(
        _lstm_kernel,
        out_shape=jax.ShapeDtypeStruct((B_pad, 128), jnp.float32),
        in_specs=[vmem] * 4,
        out_specs=vmem,
    )(x_flat, state0, w_slab, bh)
    # Lane-dense output: result lives in column 0; drop padded batch rows.
    return out[:B, 0:1]


def pad_data(x_list, x_lengths, input_size, pad_value):
    # Mirrors NetLSTM2.pad_data: (max_length, batch, input_size) filled with pad_value.
    B = len(x_list)
    T = int(max(x_lengths))
    xp = np.full((T, B, input_size), pad_value, dtype=np.float32)
    for i, length in enumerate(x_lengths):
        xp[:length, i, :] = np.asarray(x_list[i], dtype=np.float32).reshape(-1, input_size)
    return jnp.asarray(xp)


def init_params(key, input_size, num_layers, num_nodes):
    # Deterministic synthetic init (PyTorch LSTM default is U(-1/sqrt(H), 1/sqrt(H))).
    # Fused, lane-dense layout; gate order i | f | o | g along the 4H axis.
    # NOTE: loading a real PyTorch checkpoint requires a gate permutation
    # (i,f,g,o -> i,f,o,g) and a transpose of each (4H,in) weight.
    H, D, L = num_nodes, input_size, num_layers
    k = 1.0 / np.sqrt(H)
    ks = jax.random.split(key, 8)
    u = lambda kk, shape: jax.random.uniform(kk, shape, jnp.float32, -k, k)
    params = {
        "w_ih0": u(ks[0], (D, 4 * H)),           # layer 0, fused + pre-transposed
        "w_hh0": u(ks[1], (H, 4 * H)),
        "b0":    u(ks[2], (1, 4 * H)),           # b_ih0 + b_hh0 folded together
        "w_ihr": u(ks[3], (L - 1, H, 4 * H)),
        "w_hhr": u(ks[4], (L - 1, H, 4 * H)),
        "br":    u(ks[5], (L - 1, 1, 4 * H)),
        "w_fc":  u(ks[6], (H, 1)),
        "b_fc":  u(ks[7], (1, 1)),
    }
    return params


# --------------------------- pure-JAX reference ----------------------------- #
def ref_forward(x_padded, h0, c0, p):
    T, B, D = x_padded.shape
    L, _, H = h0.shape
    h = [h0[l] for l in range(L)]
    c = [c0[l] for l in range(L)]

    def gates(pre):
        i_g = jax.nn.sigmoid(pre[:, 0:H])
        f_g = jax.nn.sigmoid(pre[:, H:2 * H])
        o_g = jax.nn.sigmoid(pre[:, 2 * H:3 * H])
        g_g = jnp.tanh(pre[:, 3 * H:4 * H])
        return i_g, f_g, o_g, g_g

    for t in range(T):
        inp = x_padded[t]
        for l in range(L):
            if l == 0:
                pre = inp @ p["w_ih0"] + h[0] @ p["w_hh0"] + p["b0"]
            else:
                pre = inp @ p["w_ihr"][l - 1] + h[l] @ p["w_hhr"][l - 1] + p["br"][l - 1]
            i_g, f_g, o_g, g_g = gates(pre)
            c[l] = f_g * c[l] + i_g * g_g
            h[l] = o_g * jnp.tanh(c[l])
            inp = h[l]
    return inp @ p["w_fc"] + p["b_fc"]


# ----------------------------------- main ----------------------------------- #
if __name__ == "__main__":
    input_size = 8
    num_layers = 3
    num_nodes = 32       # "hidden" in the module (default 30; padded to kernel-friendly 32)
    pad_value = -200.0
    batch = 4
    x_lengths = [8, 6, 8, 5]                      # ragged sequence lengths (max seq = 8)

    key = jax.random.PRNGKey(0)
    k_par, k_x, k_h, k_c = jax.random.split(key, 4)

    # Ragged input batch: list of (length_i, input_size) arrays.
    xk = jax.random.split(k_x, batch)
    x_list = [jax.random.normal(xk[i], (x_lengths[i], input_size), jnp.float32)
              for i in range(batch)]

    params = init_params(k_par, input_size, num_layers, num_nodes)

    # init_hidden(batch): randn hidden / cell states (deterministic here).
    h0 = jax.random.normal(k_h, (num_layers, batch, num_nodes), jnp.float32)
    c0 = jax.random.normal(k_c, (num_layers, batch, num_nodes), jnp.float32)

    x_padded = pad_data(x_list, x_lengths, input_size, pad_value)   # (T, B, D)

    out = net_lstm2_forward(x_padded, h0, c0, params)
    out = jax.block_until_ready(out)

    ref = ref_forward(x_padded, h0, c0, params)
    assert out.shape == (batch, 1)
    assert np.allclose(np.asarray(out), np.asarray(ref), rtol=1e-4, atol=1e-4), (
        "Pallas kernel does not match reference")

    print("KERNEL_OK")
</pallas_src>

<mosaic_0001>
module attributes {stable_mosaic.version = 11 : i64} {
  func.func @_lstm_kernel(%arg0: memref<64x8xf32, #tpu.memory_space<vmem>>, %arg1: memref<6x8x32xf32, #tpu.memory_space<vmem>>, %arg2: memref<168x128xf32, #tpu.memory_space<vmem>>, %arg3: memref<4x128xf32, #tpu.memory_space<vmem>>, %arg4: memref<8x128xf32, #tpu.memory_space<vmem>>) attributes {dimension_semantics = [], scalar_prefetch = 0 : i64, scratch_operands = 0 : i64, tpu.core_type = #tpu.core_type<tc>} {
    %c0 = arith.constant 0 : index
    %c0_0 = arith.constant 0 : index
    %0 = vector.load %arg2[%c0, %c0_0] : memref<168x128xf32, #tpu.memory_space<vmem>>, vector<8x128xf32>
    %c8 = arith.constant 8 : index
    %c0_1 = arith.constant 0 : index
    %1 = vector.load %arg2[%c8, %c0_1] : memref<168x128xf32, #tpu.memory_space<vmem>>, vector<32x128xf32>
    %c40 = arith.constant 40 : index
    %c0_2 = arith.constant 0 : index
    %2 = vector.load %arg2[%c40, %c0_2] : memref<168x128xf32, #tpu.memory_space<vmem>>, vector<64x128xf32>
    %c104 = arith.constant 104 : index
    %c0_3 = arith.constant 0 : index
    %3 = vector.load %arg2[%c104, %c0_3] : memref<168x128xf32, #tpu.memory_space<vmem>>, vector<64x128xf32>
    %c0_4 = arith.constant 0 : index
    %c0_5 = arith.constant 0 : index
    %4 = vector.load %arg0[%c0_4, %c0_5] : memref<64x8xf32, #tpu.memory_space<vmem>>, vector<64x8xf32>
    %cst = arith.constant dense<0.000000e+00> : vector<64x128xf32>
    %5 = tpu.matmul %4, %0, %cst {dimension_numbers = #tpu.dot_dimension_numbers<[1], [0], [0], [1], [0, 0, 1, 1], [], []>} : vector<64x8xf32>, vector<8x128xf32>, vector<64x128xf32> -> vector<64x128xf32>
    %c0_6 = arith.constant 0 : index
    %c0_7 = arith.constant 0 : index
    %6 = vector.load %arg3[%c0_6, %c0_7] : memref<4x128xf32, #tpu.memory_space<vmem>>, vector<1x128xf32>
    %7 = vector.broadcast %6 : vector<1x128xf32> to vector<64x128xf32>
    %8 = arith.addf %5, %7 : vector<64x128xf32>
    %c1 = arith.constant 1 : index
    %c0_8 = arith.constant 0 : index
    %9 = vector.load %arg3[%c1, %c0_8] : memref<4x128xf32, #tpu.memory_space<vmem>>, vector<1x128xf32>
    %10 = vector.shape_cast %9 : vector<1x128xf32> to vector<1x128xf32>
    %11 = vector.broadcast %10 : vector<1x128xf32> to vector<8x128xf32>
    %c2 = arith.constant 2 : index
    %c0_9 = arith.constant 0 : index
    %12 = vector.load %arg3[%c2, %c0_9] : memref<4x128xf32, #tpu.memory_space<vmem>>, vector<1x128xf32>
    %13 = vector.shape_cast %12 : vector<1x128xf32> to vector<1x128xf32>
    %14 = vector.broadcast %13 : vector<1x128xf32> to vector<8x128xf32>
    %c0_10 = arith.constant 0 : index
    %c0_11 = arith.constant 0 : index
    %c0_12 = arith.constant 0 : index
    %15 = vector.load %arg1[%c0_10, %c0_11, %c0_12] : memref<6x8x32xf32, #tpu.memory_space<vmem>>, vector<1x8x32xf32>
    %16 = vector.shape_cast %15 : vector<1x8x32xf32> to vector<8x32xf32>
    %c1_13 = arith.constant 1 : index
    %c0_14 = arith.constant 0 : index
    %c0_15 = arith.constant 0 : index
    %17 = vector.load %arg1[%c1_13, %c0_14, %c0_15] : memref<6x8x32xf32, #tpu.memory_space<vmem>>, vector<1x8x32xf32>
    %18 = vector.shape_cast %17 : vector<1x8x32xf32> to vector<8x32xf32>
    %c2_16 = arith.constant 2 : index
    %c0_17 = arith.constant 0 : index
    %c0_18 = arith.constant 0 : index
    %19 = vector.load %arg1[%c2_16, %c0_17, %c0_18] : memref<6x8x32xf32, #tpu.memory_space<vmem>>, vector<1x8x32xf32>
    %20 = vector.shape_cast %19 : vector<1x8x32xf32> to vector<8x32xf32>
    %c3 = arith.constant 3 : index
    %c0_19 = arith.constant 0 : index
    %c0_20 = arith.constant 0 : index
    %21 = vector.load %arg1[%c3, %c0_19, %c0_20] : memref<6x8x32xf32, #tpu.memory_space<vmem>>, vector<1x8x32xf32>
    %22 = vector.shape_cast %21 : vector<1x8x32xf32> to vector<8x32xf32>
    %c4 = arith.constant 4 : index
    %c0_21 = arith.constant 0 : index
    %c0_22 = arith.constant 0 : index
    %23 = vector.load %arg1[%c4, %c0_21, %c0_22] : memref<6x8x32xf32, #tpu.memory_space<vmem>>, vector<1x8x32xf32>
    %24 = vector.shape_cast %23 : vector<1x8x32xf32> to vector<8x32xf32>
    %c5 = arith.constant 5 : index
    %c0_23 = arith.constant 0 : index
    %c0_24 = arith.constant 0 : index
    %25 = vector.load %arg1[%c5, %c0_23, %c0_24] : memref<6x8x32xf32, #tpu.memory_space<vmem>>, vector<1x8x32xf32>
    %26 = vector.shape_cast %25 : vector<1x8x32xf32> to vector<8x32xf32>
    %27 = vector.extract_strided_slice %8 {offsets = [0, 0], sizes = [8, 128], strides = [1, 1]} : vector<64x128xf32> to vector<8x128xf32>
    %cst_25 = arith.constant dense<0.000000e+00> : vector<8x128xf32>
    %28 = tpu.matmul %16, %1, %cst_25 {dimension_numbers = #tpu.dot_dimension_numbers<[1], [0], [0], [1], [0, 0, 1, 1], [], []>} : vector<8x32xf32>, vector<32x128xf32>, vector<8x128xf32> -> vector<8x128xf32>
    %29 = arith.addf %27, %28 : vector<8x128xf32>
    %30 = arith.negf %29 : vector<8x128xf32>
    %31 = math.exp %30 : vector<8x128xf32>
    %cst_26 = arith.constant 1.000000e+00 : f32
    %32 = vector.broadcast %cst_26 : f32 to vector<8x128xf32>
    %33 = arith.addf %32, %31 : vector<8x128xf32>
    %34 = arith.divf %32, %33 : vector<8x128xf32>
    %35 = math.tanh %29 : vector<8x128xf32>
    %36 = vector.extract_strided_slice %34 {offsets = [0, 0], sizes = [8, 32], strides = [1, 1]} : vector<8x128xf32> to vector<8x32xf32>
    %37 = vector.extract_strided_slice %34 {offsets = [0, 32], sizes = [8, 32], strides = [1, 1]} : vector<8x128xf32> to vector<8x32xf32>
    %38 = vector.extract_strided_slice %34 {offsets = [0, 64], sizes = [8, 32], strides = [1, 1]} : vector<8x128xf32> to vector<8x32xf32>
    %39 = vector.extract_strided_slice %35 {offsets = [0, 96], sizes = [8, 32], strides = [1, 1]} : vector<8x128xf32> to vector<8x32xf32>
    %40 = arith.mulf %37, %22 : vector<8x32xf32>
    %41 = arith.mulf %36, %39 : vector<8x32xf32>
    %42 = arith.addf %40, %41 : vector<8x32xf32>
    %43 = math.tanh %42 : vector<8x32xf32>
    %44 = arith.mulf %38, %43 : vector<8x32xf32>
    %45 = tpu.concatenate %44, %18 in 1 : vector<8x32xf32>, vector<8x32xf32> -> vector<8x64xf32>
    %cst_27 = arith.constant dense<0.000000e+00> : vector<8x128xf32>
    %46 = tpu.matmul %45, %2, %cst_27 {dimension_numbers = #tpu.dot_dimension_numbers<[1], [0], [0], [1], [0, 0, 1, 1], [], []>} : vector<8x64xf32>, vector<64x128xf32>, vector<8x128xf32> -> vector<8x128xf32>
    %47 = arith.addf %46, %11 : vector<8x128xf32>
    %48 = arith.negf %47 : vector<8x128xf32>
    %49 = math.exp %48 : vector<8x128xf32>
    %cst_28 = arith.constant 1.000000e+00 : f32
    %50 = vector.broadcast %cst_28 : f32 to vector<8x128xf32>
    %51 = arith.addf %50, %49 : vector<8x128xf32>
    %52 = arith.divf %50, %51 : vector<8x128xf32>
    %53 = math.tanh %47 : vector<8x128xf32>
    %54 = vector.extract_strided_slice %52 {offsets = [0, 0], sizes = [8, 32], strides = [1, 1]} : vector<8x128xf32> to vector<8x32xf32>
    %55 = vector.extract_strided_slice %52 {offsets = [0, 32], sizes = [8, 32], strides = [1, 1]} : vector<8x128xf32> to vector<8x32xf32>
    %56 = vector.extract_strided_slice %52 {offsets = [0, 64], sizes = [8, 32], strides = [1, 1]} : vector<8x128xf32> to vector<8x32xf32>
    %57 = vector.extract_strided_slice %53 {offsets = [0, 96], sizes = [8, 32], strides = [1, 1]} : vector<8x128xf32> to vector<8x32xf32>
    %58 = arith.mulf %55, %24 : vector<8x32xf32>
    %59 = arith.mulf %54, %57 : vector<8x32xf32>
    %60 = arith.addf %58, %59 : vector<8x32xf32>
    %61 = math.tanh %60 : vector<8x32xf32>
    %62 = arith.mulf %56, %61 : vector<8x32xf32>
    %63 = tpu.concatenate %62, %20 in 1 : vector<8x32xf32>, vector<8x32xf32> -> vector<8x64xf32>
    %cst_29 = arith.constant dense<0.000000e+00> : vector<8x128xf32>
    %64 = tpu.matmul %63, %3, %cst_29 {dimension_numbers = #tpu.dot_dimension_numbers<[1], [0], [0], [1], [0, 0, 1, 1], [], []>} : vector<8x64xf32>, vector<64x128xf32>, vector<8x128xf32> -> vector<8x128xf32>
    %65 = arith.addf %64, %14 : vector<8x128xf32>
    %66 = arith.negf %65 : vector<8x128xf32>
    %67 = math.exp %66 : vector<8x128xf32>
    %cst_30 = arith.constant 1.000000e+00 : f32
    %68 = vector.broadcast %cst_30 : f32 to vector<8x128xf32>
    %69 = arith.addf %68, %67 : vector<8x128xf32>
    %70 = arith.divf %68, %69 : vector<8x128xf32>
    %71 = math.tanh %65 : vector<8x128xf32>
    %72 = vector.extract_strided_slice %70 {offsets = [0, 0], sizes = [8, 32], strides = [1, 1]} : vector<8x128xf32> to vector<8x32xf32>
    %73 = vector.extract_strided_slice %70 {offsets = [0, 32], sizes = [8, 32], strides = [1, 1]} : vector<8x128xf32> to vector<8x32xf32>
    %74 = vector.extract_strided_slice %70 {offsets = [0, 64], sizes = [8, 32], strides = [1, 1]} : vector<8x128xf32> to vector<8x32xf32>
    %75 = vector.extract_strided_slice %71 {offsets = [0, 96], sizes = [8, 32], strides = [1, 1]} : vector<8x128xf32> to vector<8x32xf32>
    %76 = arith.mulf %73, %26 : vector<8x32xf32>
    %77 = arith.mulf %72, %75 : vector<8x32xf32>
    %78 = arith.addf %76, %77 : vector<8x32xf32>
    %79 = math.tanh %78 : vector<8x32xf32>
    %80 = arith.mulf %74, %79 : vector<8x32xf32>
    %81 = vector.extract_strided_slice %8 {offsets = [8, 0], sizes = [8, 128], strides = [1, 1]} : vector<64x128xf32> to vector<8x128xf32>
    %cst_31 = arith.constant dense<0.000000e+00> : vector<8x128xf32>
    %82 = tpu.matmul %44, %1, %cst_31 {dimension_numbers = #tpu.dot_dimension_numbers<[1], [0], [0], [1], [0, 0, 1, 1], [], []>} : vector<8x32xf32>, vector<32x128xf32>, vector<8x128xf32> -> vector<8x128xf32>
    %83 = arith.addf %81, %82 : vector<8x128xf32>
    %84 = arith.negf %83 : vector<8x128xf32>
    %85 = math.exp %84 : vector<8x128xf32>
    %cst_32 = arith.constant 1.000000e+00 : f32
    %86 = vector.broadcast %cst_32 : f32 to vector<8x128xf32>
    %87 = arith.addf %86, %85 : vector<8x128xf32>
    %88 = arith.divf %86, %87 : vector<8x128xf32>
    %89 = math.tanh %83 : vector<8x128xf32>
    %90 = vector.extract_strided_slice %88 {offsets = [0, 0], sizes = [8, 32], strides = [1, 1]} : vector<8x128xf32> to vector<8x32xf32>
    %91 = vector.extract_strided_slice %88 {offsets = [0, 32], sizes = [8, 32], strides = [1, 1]} : vector<8x128xf32> to vector<8x32xf32>
    %92 = vector.extract_strided_slice %88 {offsets = [0, 64], sizes = [8, 32], strides = [1, 1]} : vector<8x128xf32> to vector<8x32xf32>
    %93 = vector.extract_strided_slice %89 {offsets = [0, 96], sizes = [8, 32], strides = [1, 1]} : vector<8x128xf32> to vector<8x32xf32>
    %94 = arith.mulf %91, %42 : vector<8x32xf32>
    %95 = arith.mulf %90, %93 : vector<8x32xf32>
    %96 = arith.addf %94, %95 : vector<8x32xf32>
    %97 = math.tanh %96 : vector<8x32xf32>
    %98 = arith.mulf %92, %97 : vector<8x32xf32>
    %99 = tpu.concatenate %98, %62 in 1 : vector<8x32xf32>, vector<8x32xf32> -> vector<8x64xf32>
    %cst_33 = arith.constant dense<0.000000e+00> : vector<8x128xf32>
    %100 = tpu.matmul %99, %2, %cst_33 {dimension_numbers = #tpu.dot_dimension_numbers<[1], [0], [0], [1], [0, 0, 1, 1], [], []>} : vector<8x64xf32>, vector<64x128xf32>, vector<8x128xf32> -> vector<8x128xf32>
    %101 = arith.addf %100, %11 : vector<8x128xf32>
    %102 = arith.negf %101 : vector<8x128xf32>
    %103 = math.exp %102 : vector<8x128xf32>
    %cst_34 = arith.constant 1.000000e+00 : f32
    %104 = vector.broadcast %cst_34 : f32 to vector<8x128xf32>
    %105 = arith.addf %104, %103 : vector<8x128xf32>
    %106 = arith.divf %104, %105 : vector<8x128xf32>
    %107 = math.tanh %101 : vector<8x128xf32>
    %108 = vector.extract_strided_slice %106 {offsets = [0, 0], sizes = [8, 32], strides = [1, 1]} : vector<8x128xf32> to vector<8x32xf32>
    %109 = vector.extract_strided_slice %106 {offsets = [0, 32], sizes = [8, 32], strides = [1, 1]} : vector<8x128xf32> to vector<8x32xf32>
    %110 = vector.extract_strided_slice %106 {offsets = [0, 64], sizes = [8, 32], strides = [1, 1]} : vector<8x128xf32> to vector<8x32xf32>
    %111 = vector.extract_strided_slice %107 {offsets = [0, 96], sizes = [8, 32], strides = [1, 1]} : vector<8x128xf32> to vector<8x32xf32>
    %112 = arith.mulf %109, %60 : vector<8x32xf32>
    %113 = arith.mulf %108, %111 : vector<8x32xf32>
    %114 = arith.addf %112, %113 : vector<8x32xf32>
    %115 = math.tanh %114 : vector<8x32xf32>
    %116 = arith.mulf %110, %115 : vector<8x32xf32>
    %117 = tpu.concatenate %116, %80 in 1 : vector<8x32xf32>, vector<8x32xf32> -> vector<8x64xf32>
    %cst_35 = arith.constant dense<0.000000e+00> : vector<8x128xf32>
    %118 = tpu.matmul %117, %3, %cst_35 {dimension_numbers = #tpu.dot_dimension_numbers<[1], [0], [0], [1], [0, 0, 1, 1], [], []>} : vector<8x64xf32>, vector<64x128xf32>, vector<8x128xf32> -> vector<8x128xf32>
    %119 = arith.addf %118, %14 : vector<8x128xf32>
    %120 = arith.negf %119 : vector<8x128xf32>
    %121 = math.exp %120 : vector<8x128xf32>
    %cst_36 = arith.constant 1.000000e+00 : f32
    %122 = vector.broadcast %cst_36 : f32 to vector<8x128xf32>
    %123 = arith.addf %122, %121 : vector<8x128xf32>
    %124 = arith.divf %122, %123 : vector<8x128xf32>
    %125 = math.tanh %119 : vector<8x128xf32>
    %126 = vector.extract_strided_slice %124 {offsets = [0, 0], sizes = [8, 32], strides = [1, 1]} : vector<8x128xf32> to vector<8x32xf32>
    %127 = vector.extract_strided_slice %124 {offsets = [0, 32], sizes = [8, 32], strides = [1, 1]} : vector<8x128xf32> to vector<8x32xf32>
    %128 = vector.extract_strided_slice %124 {offsets = [0, 64], sizes = [8, 32], strides = [1, 1]} : vector<8x128xf32> to vector<8x32xf32>
    %129 = vector.extract_strided_slice %125 {offsets = [0, 96], sizes = [8, 32], strides = [1, 1]} : vector<8x128xf32> to vector<8x32xf32>
    %130 = arith.mulf %127, %78 : vector<8x32xf32>
    %131 = arith.mulf %126, %129 : vector<8x32xf32>
    %132 = arith.addf %130, %131 : vector<8x32xf32>
    %133 = math.tanh %132 : vector<8x32xf32>
    %134 = arith.mulf %128, %133 : vector<8x32xf32>
    %135 = vector.extract_strided_slice %8 {offsets = [16, 0], sizes = [8, 128], strides = [1, 1]} : vector<64x128xf32> to vector<8x128xf32>
    %cst_37 = arith.constant dense<0.000000e+00> : vector<8x128xf32>
    %136 = tpu.matmul %98, %1, %cst_37 {dimension_numbers = #tpu.dot_dimension_numbers<[1], [0], [0], [1], [0, 0, 1, 1], [], []>} : vector<8x32xf32>, vector<32x128xf32>, vector<8x128xf32> -> vector<8x128xf32>
    %137 = arith.addf %135, %136 : vector<8x128xf32>
    %138 = arith.negf %137 : vector<8x128xf32>
    %139 = math.exp %138 : vector<8x128xf32>
    %cst_38 = arith.constant 1.000000e+00 : f32
    %140 = vector.broadcast %cst_38 : f32 to vector<8x128xf32>
    %141 = arith.addf %140, %139 : vector<8x128xf32>
    %142 = arith.divf %140, %141 : vector<8x128xf32>
    %143 = math.tanh %137 : vector<8x128xf32>
    %144 = vector.extract_strided_slice %142 {offsets = [0, 0], sizes = [8, 32], strides = [1, 1]} : vector<8x128xf32> to vector<8x32xf32>
    %145 = vector.extract_strided_slice %142 {offsets = [0, 32], sizes = [8, 32], strides = [1, 1]} : vector<8x128xf32> to vector<8x32xf32>
    %146 = vector.extract_strided_slice %142 {offsets = [0, 64], sizes = [8, 32], strides = [1, 1]} : vector<8x128xf32> to vector<8x32xf32>
    %147 = vector.extract_strided_slice %143 {offsets = [0, 96], sizes = [8, 32], strides = [1, 1]} : vector<8x128xf32> to vector<8x32xf32>
    %148 = arith.mulf %145, %96 : vector<8x32xf32>
    %149 = arith.mulf %144, %147 : vector<8x32xf32>
    %150 = arith.addf %148, %149 : vector<8x32xf32>
    %151 = math.tanh %150 : vector<8x32xf32>
    %152 = arith.mulf %146, %151 : vector<8x32xf32>
    %153 = tpu.concatenate %152, %116 in 1 : vector<8x32xf32>, vector<8x32xf32> -> vector<8x64xf32>
    %cst_39 = arith.constant dense<0.000000e+00> : vector<8x128xf32>
    %154 = tpu.matmul %153, %2, %cst_39 {dimension_numbers = #tpu.dot_dimension_numbers<[1], [0], [0], [1], [0, 0, 1, 1], [], []>} : vector<8x64xf32>, vector<64x128xf32>, vector<8x128xf32> -> vector<8x128xf32>
    %155 = arith.addf %154, %11 : vector<8x128xf32>
    %156 = arith.negf %155 : vector<8x128xf32>
    %157 = math.exp %156 : vector<8x128xf32>
    %cst_40 = arith.constant 1.000000e+00 : f32
    %158 = vector.broadcast %cst_40 : f32 to vector<8x128xf32>
    %159 = arith.addf %158, %157 : vector<8x128xf32>
    %160 = arith.divf %158, %159 : vector<8x128xf32>
    %161 = math.tanh %155 : vector<8x128xf32>
    %162 = vector.extract_strided_slice %160 {offsets = [0, 0], sizes = [8, 32], strides = [1, 1]} : vector<8x128xf32> to vector<8x32xf32>
    %163 = vector.extract_strided_slice %160 {offsets = [0, 32], sizes = [8, 32], strides = [1, 1]} : vector<8x128xf32> to vector<8x32xf32>
    %164 = vector.extract_strided_slice %160 {offsets = [0, 64], sizes = [8, 32], strides = [1, 1]} : vector<8x128xf32> to vector<8x32xf32>
    %165 = vector.extract_strided_slice %161 {offsets = [0, 96], sizes = [8, 32], strides = [1, 1]} : vector<8x128xf32> to vector<8x32xf32>
    %166 = arith.mulf %163, %114 : vector<8x32xf32>
    %167 = arith.mulf %162, %165 : vector<8x32xf32>
    %168 = arith.addf %166, %167 : vector<8x32xf32>
    %169 = math.tanh %168 : vector<8x32xf32>
    %170 = arith.mulf %164, %169 : vector<8x32xf32>
    %171 = tpu.concatenate %170, %134 in 1 : vector<8x32xf32>, vector<8x32xf32> -> vector<8x64xf32>
    %cst_41 = arith.constant dense<0.000000e+00> : vector<8x128xf32>
    %172 = tpu.matmul %171, %3, %cst_41 {dimension_numbers = #tpu.dot_dimension_numbers<[1], [0], [0], [1], [0, 0, 1, 1], [], []>} : vector<8x64xf32>, vector<64x128xf32>, vector<8x128xf32> -> vector<8x128xf32>
    %173 = arith.addf %172, %14 : vector<8x128xf32>
    %174 = arith.negf %173 : vector<8x128xf32>
    %175 = math.exp %174 : vector<8x128xf32>
    %cst_42 = arith.constant 1.000000e+00 : f32
    %176 = vector.broadcast %cst_42 : f32 to vector<8x128xf32>
    %177 = arith.addf %176, %175 : vector<8x128xf32>
    %178 = arith.divf %176, %177 : vector<8x128xf32>
    %179 = math.tanh %173 : vector<8x128xf32>
    %180 = vector.extract_strided_slice %178 {offsets = [0, 0], sizes = [8, 32], strides = [1, 1]} : vector<8x128xf32> to vector<8x32xf32>
    %181 = vector.extract_strided_slice %178 {offsets = [0, 32], sizes = [8, 32], strides = [1, 1]} : vector<8x128xf32> to vector<8x32xf32>
    %182 = vector.extract_strided_slice %178 {offsets = [0, 64], sizes = [8, 32], strides = [1, 1]} : vector<8x128xf32> to vector<8x32xf32>
    %183 = vector.extract_strided_slice %179 {offsets = [0, 96], sizes = [8, 32], strides = [1, 1]} : vector<8x128xf32> to vector<8x32xf32>
    %184 = arith.mulf %181, %132 : vector<8x32xf32>
    %185 = arith.mulf %180, %183 : vector<8x32xf32>
    %186 = arith.addf %184, %185 : vector<8x32xf32>
    %187 = math.tanh %186 : vector<8x32xf32>
    %188 = arith.mulf %182, %187 : vector<8x32xf32>
    %189 = vector.extract_strided_slice %8 {offsets = [24, 0], sizes = [8, 128], strides = [1, 1]} : vector<64x128xf32> to vector<8x128xf32>
    %cst_43 = arith.constant dense<0.000000e+00> : vector<8x128xf32>
    %190 = tpu.matmul %152, %1, %cst_43 {dimension_numbers = #tpu.dot_dimension_numbers<[1], [0], [0], [1], [0, 0, 1, 1], [], []>} : vector<8x32xf32>, vector<32x128xf32>, vector<8x128xf32> -> vector<8x128xf32>
    %191 = arith.addf %189, %190 : vector<8x128xf32>
    %192 = arith.negf %191 : vector<8x128xf32>
    %193 = math.exp %192 : vector<8x128xf32>
    %cst_44 = arith.constant 1.000000e+00 : f32
    %194 = vector.broadcast %cst_44 : f32 to vector<8x128xf32>
    %195 = arith.addf %194, %193 : vector<8x128xf32>
    %196 = arith.divf %194, %195 : vector<8x128xf32>
    %197 = math.tanh %191 : vector<8x128xf32>
    %198 = vector.extract_strided_slice %196 {offsets = [0, 0], sizes = [8, 32], strides = [1, 1]} : vector<8x128xf32> to vector<8x32xf32>
    %199 = vector.extract_strided_slice %196 {offsets = [0, 32], sizes = [8, 32], strides = [1, 1]} : vector<8x128xf32> to vector<8x32xf32>
    %200 = vector.extract_strided_slice %196 {offsets = [0, 64], sizes = [8, 32], strides = [1, 1]} : vector<8x128xf32> to vector<8x32xf32>
    %201 = vector.extract_strided_slice %197 {offsets = [0, 96], sizes = [8, 32], strides = [1, 1]} : vector<8x128xf32> to vector<8x32xf32>
    %202 = arith.mulf %199, %150 : vector<8x32xf32>
    %203 = arith.mulf %198, %201 : vector<8x32xf32>
    %204 = arith.addf %202, %203 : vector<8x32xf32>
    %205 = math.tanh %204 : vector<8x32xf32>
    %206 = arith.mulf %200, %205 : vector<8x32xf32>
    %207 = tpu.concatenate %206, %170 in 1 : vector<8x32xf32>, vector<8x32xf32> -> vector<8x64xf32>
    %cst_45 = arith.constant dense<0.000000e+00> : vector<8x128xf32>
    %208 = tpu.matmul %207, %2, %cst_45 {dimension_numbers = #tpu.dot_dimension_numbers<[1], [0], [0], [1], [0, 0, 1, 1], [], []>} : vector<8x64xf32>, vector<64x128xf32>, vector<8x128xf32> -> vector<8x128xf32>
    %209 = arith.addf %208, %11 : vector<8x128xf32>
    %210 = arith.negf %209 : vector<8x128xf32>
    %211 = math.exp %210 : vector<8x128xf32>
    %cst_46 = arith.constant 1.000000e+00 : f32
    %212 = vector.broadcast %cst_46 : f32 to vector<8x128xf32>
    %213 = arith.addf %212, %211 : vector<8x128xf32>
    %214 = arith.divf %212, %213 : vector<8x128xf32>
    %215 = math.tanh %209 : vector<8x128xf32>
    %216 = vector.extract_strided_slice %214 {offsets = [0, 0], sizes = [8, 32], strides = [1, 1]} : vector<8x128xf32> to vector<8x32xf32>
    %217 = vector.extract_strided_slice %214 {offsets = [0, 32], sizes = [8, 32], strides = [1, 1]} : vector<8x128xf32> to vector<8x32xf32>
    %218 = vector.extract_strided_slice %214 {offsets = [0, 64], sizes = [8, 32], strides = [1, 1]} : vector<8x128xf32> to vector<8x32xf32>
    %219 = vector.extract_strided_slice %215 {offsets = [0, 96], sizes = [8, 32], strides = [1, 1]} : vector<8x128xf32> to vector<8x32xf32>
    %220 = arith.mulf %217, %168 : vector<8x32xf32>
    %221 = arith.mulf %216, %219 : vector<8x32xf32>
    %222 = arith.addf %220, %221 : vector<8x32xf32>
    %223 = math.tanh %222 : vector<8x32xf32>
    %224 = arith.mulf %218, %223 : vector<8x32xf32>
    %225 = tpu.concatenate %224, %188 in 1 : vector<8x32xf32>, vector<8x32xf32> -> vector<8x64xf32>
    %cst_47 = arith.constant dense<0.000000e+00> : vector<8x128xf32>
    %226 = tpu.matmul %225, %3, %cst_47 {dimension_numbers = #tpu.dot_dimension_numbers<[1], [0], [0], [1], [0, 0, 1, 1], [], []>} : vector<8x64xf32>, vector<64x128xf32>, vector<8x128xf32> -> vector<8x128xf32>
    %227 = arith.addf %226, %14 : vector<8x128xf32>
    %228 = arith.negf %227 : vector<8x128xf32>
    %229 = math.exp %228 : vector<8x128xf32>
    %cst_48 = arith.constant 1.000000e+00 : f32
    %230 = vector.broadcast %cst_48 : f32 to vector<8x128xf32>
    %231 = arith.addf %230, %229 : vector<8x128xf32>
    %232 = arith.divf %230, %231 : vector<8x128xf32>
    %233 = math.tanh %227 : vector<8x128xf32>
    %234 = vector.extract_strided_slice %232 {offsets = [0, 0], sizes = [8, 32], strides = [1, 1]} : vector<8x128xf32> to vector<8x32xf32>
    %235 = vector.extract_strided_slice %232 {offsets = [0, 32], sizes = [8, 32], strides = [1, 1]} : vector<8x128xf32> to vector<8x32xf32>
    %236 = vector.extract_strided_slice %232 {offsets = [0, 64], sizes = [8, 32], strides = [1, 1]} : vector<8x128xf32> to vector<8x32xf32>
    %237 = vector.extract_strided_slice %233 {offsets = [0, 96], sizes = [8, 32], strides = [1, 1]} : vector<8x128xf32> to vector<8x32xf32>
    %238 = arith.mulf %235, %186 : vector<8x32xf32>
    %239 = arith.mulf %234, %237 : vector<8x32xf32>
    %240 = arith.addf %238, %239 : vector<8x32xf32>
    %241 = math.tanh %240 : vector<8x32xf32>
    %242 = arith.mulf %236, %241 : vector<8x32xf32>
    %243 = vector.extract_strided_slice %8 {offsets = [32, 0], sizes = [8, 128], strides = [1, 1]} : vector<64x128xf32> to vector<8x128xf32>
    %cst_49 = arith.constant dense<0.000000e+00> : vector<8x128xf32>
    %244 = tpu.matmul %206, %1, %cst_49 {dimension_numbers = #tpu.dot_dimension_numbers<[1], [0], [0], [1], [0, 0, 1, 1], [], []>} : vector<8x32xf32>, vector<32x128xf32>, vector<8x128xf32> -> vector<8x128xf32>
    %245 = arith.addf %243, %244 : vector<8x128xf32>
    %246 = arith.negf %245 : vector<8x128xf32>
    %247 = math.exp %246 : vector<8x128xf32>
    %cst_50 = arith.constant 1.000000e+00 : f32
    %248 = vector.broadcast %cst_50 : f32 to vector<8x128xf32>
    %249 = arith.addf %248, %247 : vector<8x128xf32>
    %250 = arith.divf %248, %249 : vector<8x128xf32>
    %251 = math.tanh %245 : vector<8x128xf32>
    %252 = vector.extract_strided_slice %250 {offsets = [0, 0], sizes = [8, 32], strides = [1, 1]} : vector<8x128xf32> to vector<8x32xf32>
    %253 = vector.extract_strided_slice %250 {offsets = [0, 32], sizes = [8, 32], strides = [1, 1]} : vector<8x128xf32> to vector<8x32xf32>
    %254 = vector.extract_strided_slice %250 {offsets = [0, 64], sizes = [8, 32], strides = [1, 1]} : vector<8x128xf32> to vector<8x32xf32>
    %255 = vector.extract_strided_slice %251 {offsets = [0, 96], sizes = [8, 32], strides = [1, 1]} : vector<8x128xf32> to vector<8x32xf32>
    %256 = arith.mulf %253, %204 : vector<8x32xf32>
    %257 = arith.mulf %252, %255 : vector<8x32xf32>
    %258 = arith.addf %256, %257 : vector<8x32xf32>
    %259 = math.tanh %258 : vector<8x32xf32>
    %260 = arith.mulf %254, %259 : vector<8x32xf32>
    %261 = tpu.concatenate %260, %224 in 1 : vector<8x32xf32>, vector<8x32xf32> -> vector<8x64xf32>
    %cst_51 = arith.constant dense<0.000000e+00> : vector<8x128xf32>
    %262 = tpu.matmul %261, %2, %cst_51 {dimension_numbers = #tpu.dot_dimension_numbers<[1], [0], [0], [1], [0, 0, 1, 1], [], []>} : vector<8x64xf32>, vector<64x128xf32>, vector<8x128xf32> -> vector<8x128xf32>
    %263 = arith.addf %262, %11 : vector<8x128xf32>
    %264 = arith.negf %263 : vector<8x128xf32>
    %265 = math.exp %264 : vector<8x128xf32>
    %cst_52 = arith.constant 1.000000e+00 : f32
    %266 = vector.broadcast %cst_52 : f32 to vector<8x128xf32>
    %267 = arith.addf %266, %265 : vector<8x128xf32>
    %268 = arith.divf %266, %267 : vector<8x128xf32>
    %269 = math.tanh %263 : vector<8x128xf32>
    %270 = vector.extract_strided_slice %268 {offsets = [0, 0], sizes = [8, 32], strides = [1, 1]} : vector<8x128xf32> to vector<8x32xf32>
    %271 = vector.extract_strided_slice %268 {offsets = [0, 32], sizes = [8, 32], strides = [1, 1]} : vector<8x128xf32> to vector<8x32xf32>
    %272 = vector.extract_strided_slice %268 {offsets = [0, 64], sizes = [8, 32], strides = [1, 1]} : vector<8x128xf32> to vector<8x32xf32>
    %273 = vector.extract_strided_slice %269 {offsets = [0, 96], sizes = [8, 32], strides = [1, 1]} : vector<8x128xf32> to vector<8x32xf32>
    %274 = arith.mulf %271, %222 : vector<8x32xf32>
    %275 = arith.mulf %270, %273 : vector<8x32xf32>
    %276 = arith.addf %274, %275 : vector<8x32xf32>
    %277 = math.tanh %276 : vector<8x32xf32>
    %278 = arith.mulf %272, %277 : vector<8x32xf32>
    %279 = tpu.concatenate %278, %242 in 1 : vector<8x32xf32>, vector<8x32xf32> -> vector<8x64xf32>
    %cst_53 = arith.constant dense<0.000000e+00> : vector<8x128xf32>
    %280 = tpu.matmul %279, %3, %cst_53 {dimension_numbers = #tpu.dot_dimension_numbers<[1], [0], [0], [1], [0, 0, 1, 1], [], []>} : vector<8x64xf32>, vector<64x128xf32>, vector<8x128xf32> -> vector<8x128xf32>
    %281 = arith.addf %280, %14 : vector<8x128xf32>
    %282 = arith.negf %281 : vector<8x128xf32>
    %283 = math.exp %282 : vector<8x128xf32>
    %cst_54 = arith.constant 1.000000e+00 : f32
    %284 = vector.broadcast %cst_54 : f32 to vector<8x128xf32>
    %285 = arith.addf %284, %283 : vector<8x128xf32>
    %286 = arith.divf %284, %285 : vector<8x128xf32>
    %287 = math.tanh %281 : vector<8x128xf32>
    %288 = vector.extract_strided_slice %286 {offsets = [0, 0], sizes = [8, 32], strides = [1, 1]} : vector<8x128xf32> to vector<8x32xf32>
    %289 = vector.extract_strided_slice %286 {offsets = [0, 32], sizes = [8, 32], strides = [1, 1]} : vector<8x128xf32> to vector<8x32xf32>
    %290 = vector.extract_strided_slice %286 {offsets = [0, 64], sizes = [8, 32], strides = [1, 1]} : vector<8x128xf32> to vector<8x32xf32>
    %291 = vector.extract_strided_slice %287 {offsets = [0, 96], sizes = [8, 32], strides = [1, 1]} : vector<8x128xf32> to vector<8x32xf32>
    %292 = arith.mulf %289, %240 : vector<8x32xf32>
    %293 = arith.mulf %288, %291 : vector<8x32xf32>
    %294 = arith.addf %292, %293 : vector<8x32xf32>
    %295 = math.tanh %294 : vector<8x32xf32>
    %296 = arith.mulf %290, %295 : vector<8x32xf32>
    %297 = vector.extract_strided_slice %8 {offsets = [40, 0], sizes = [8, 128], strides = [1, 1]} : vector<64x128xf32> to vector<8x128xf32>
    %cst_55 = arith.constant dense<0.000000e+00> : vector<8x128xf32>
    %298 = tpu.matmul %260, %1, %cst_55 {dimension_numbers = #tpu.dot_dimension_numbers<[1], [0], [0], [1], [0, 0, 1, 1], [], []>} : vector<8x32xf32>, vector<32x128xf32>, vector<8x128xf32> -> vector<8x128xf32>
    %299 = arith.addf %297, %298 : vector<8x128xf32>
    %300 = arith.negf %299 : vector<8x128xf32>
    %301 = math.exp %300 : vector<8x128xf32>
    %cst_56 = arith.constant 1.000000e+00 : f32
    %302 = vector.broadcast %cst_56 : f32 to vector<8x128xf32>
    %303 = arith.addf %302, %301 : vector<8x128xf32>
    %304 = arith.divf %302, %303 : vector<8x128xf32>
    %305 = math.tanh %299 : vector<8x128xf32>
    %306 = vector.extract_strided_slice %304 {offsets = [0, 0], sizes = [8, 32], strides = [1, 1]} : vector<8x128xf32> to vector<8x32xf32>
    %307 = vector.extract_strided_slice %304 {offsets = [0, 32], sizes = [8, 32], strides = [1, 1]} : vector<8x128xf32> to vector<8x32xf32>
    %308 = vector.extract_strided_slice %304 {offsets = [0, 64], sizes = [8, 32], strides = [1, 1]} : vector<8x128xf32> to vector<8x32xf32>
    %309 = vector.extract_strided_slice %305 {offsets = [0, 96], sizes = [8, 32], strides = [1, 1]} : vector<8x128xf32> to vector<8x32xf32>
    %310 = arith.mulf %307, %258 : vector<8x32xf32>
    %311 = arith.mulf %306, %309 : vector<8x32xf32>
    %312 = arith.addf %310, %311 : vector<8x32xf32>
    %313 = math.tanh %312 : vector<8x32xf32>
    %314 = arith.mulf %308, %313 : vector<8x32xf32>
    %315 = tpu.concatenate %314, %278 in 1 : vector<8x32xf32>, vector<8x32xf32> -> vector<8x64xf32>
    %cst_57 = arith.constant dense<0.000000e+00> : vector<8x128xf32>
    %316 = tpu.matmul %315, %2, %cst_57 {dimension_numbers = #tpu.dot_dimension_numbers<[1], [0], [0], [1], [0, 0, 1, 1], [], []>} : vector<8x64xf32>, vector<64x128xf32>, vector<8x128xf32> -> vector<8x128xf32>
    %317 = arith.addf %316, %11 : vector<8x128xf32>
    %318 = arith.negf %317 : vector<8x128xf32>
    %319 = math.exp %318 : vector<8x128xf32>
    %cst_58 = arith.constant 1.000000e+00 : f32
    %320 = vector.broadcast %cst_58 : f32 to vector<8x128xf32>
    %321 = arith.addf %320, %319 : vector<8x128xf32>
    %322 = arith.divf %320, %321 : vector<8x128xf32>
    %323 = math.tanh %317 : vector<8x128xf32>
    %324 = vector.extract_strided_slice %322 {offsets = [0, 0], sizes = [8, 32], strides = [1, 1]} : vector<8x128xf32> to vector<8x32xf32>
    %325 = vector.extract_strided_slice %322 {offsets = [0, 32], sizes = [8, 32], strides = [1, 1]} : vector<8x128xf32> to vector<8x32xf32>
    %326 = vector.extract_strided_slice %322 {offsets = [0, 64], sizes = [8, 32], strides = [1, 1]} : vector<8x128xf32> to vector<8x32xf32>
    %327 = vector.extract_strided_slice %323 {offsets = [0, 96], sizes = [8, 32], strides = [1, 1]} : vector<8x128xf32> to vector<8x32xf32>
    %328 = arith.mulf %325, %276 : vector<8x32xf32>
    %329 = arith.mulf %324, %327 : vector<8x32xf32>
    %330 = arith.addf %328, %329 : vector<8x32xf32>
    %331 = math.tanh %330 : vector<8x32xf32>
    %332 = arith.mulf %326, %331 : vector<8x32xf32>
    %333 = tpu.concatenate %332, %296 in 1 : vector<8x32xf32>, vector<8x32xf32> -> vector<8x64xf32>
    %cst_59 = arith.constant dense<0.000000e+00> : vector<8x128xf32>
    %334 = tpu.matmul %333, %3, %cst_59 {dimension_numbers = #tpu.dot_dimension_numbers<[1], [0], [0], [1], [0, 0, 1, 1], [], []>} : vector<8x64xf32>, vector<64x128xf32>, vector<8x128xf32> -> vector<8x128xf32>
    %335 = arith.addf %334, %14 : vector<8x128xf32>
    %336 = arith.negf %335 : vector<8x128xf32>
    %337 = math.exp %336 : vector<8x128xf32>
    %cst_60 = arith.constant 1.000000e+00 : f32
    %338 = vector.broadcast %cst_60 : f32 to vector<8x128xf32>
    %339 = arith.addf %338, %337 : vector<8x128xf32>
    %340 = arith.divf %338, %339 : vector<8x128xf32>
    %341 = math.tanh %335 : vector<8x128xf32>
    %342 = vector.extract_strided_slice %340 {offsets = [0, 0], sizes = [8, 32], strides = [1, 1]} : vector<8x128xf32> to vector<8x32xf32>
    %343 = vector.extract_strided_slice %340 {offsets = [0, 32], sizes = [8, 32], strides = [1, 1]} : vector<8x128xf32> to vector<8x32xf32>
    %344 = vector.extract_strided_slice %340 {offsets = [0, 64], sizes = [8, 32], strides = [1, 1]} : vector<8x128xf32> to vector<8x32xf32>
    %345 = vector.extract_strided_slice %341 {offsets = [0, 96], sizes = [8, 32], strides = [1, 1]} : vector<8x128xf32> to vector<8x32xf32>
    %346 = arith.mulf %343, %294 : vector<8x32xf32>
    %347 = arith.mulf %342, %345 : vector<8x32xf32>
    %348 = arith.addf %346, %347 : vector<8x32xf32>
    %349 = math.tanh %348 : vector<8x32xf32>
    %350 = arith.mulf %344, %349 : vector<8x32xf32>
    %351 = vector.extract_strided_slice %8 {offsets = [48, 0], sizes = [8, 128], strides = [1, 1]} : vector<64x128xf32> to vector<8x128xf32>
    %cst_61 = arith.constant dense<0.000000e+00> : vector<8x128xf32>
    %352 = tpu.matmul %314, %1, %cst_61 {dimension_numbers = #tpu.dot_dimension_numbers<[1], [0], [0], [1], [0, 0, 1, 1], [], []>} : vector<8x32xf32>, vector<32x128xf32>, vector<8x128xf32> -> vector<8x128xf32>
    %353 = arith.addf %351, %352 : vector<8x128xf32>
    %354 = arith.negf %353 : vector<8x128xf32>
    %355 = math.exp %354 : vector<8x128xf32>
    %cst_62 = arith.constant 1.000000e+00 : f32
    %356 = vector.broadcast %cst_62 : f32 to vector<8x128xf32>
    %357 = arith.addf %356, %355 : vector<8x128xf32>
    %358 = arith.divf %356, %357 : vector<8x128xf32>
    %359 = math.tanh %353 : vector<8x128xf32>
    %360 = vector.extract_strided_slice %358 {offsets = [0, 0], sizes = [8, 32], strides = [1, 1]} : vector<8x128xf32> to vector<8x32xf32>
    %361 = vector.extract_strided_slice %358 {offsets = [0, 32], sizes = [8, 32], strides = [1, 1]} : vector<8x128xf32> to vector<8x32xf32>
    %362 = vector.extract_strided_slice %358 {offsets = [0, 64], sizes = [8, 32], strides = [1, 1]} : vector<8x128xf32> to vector<8x32xf32>
    %363 = vector.extract_strided_slice %359 {offsets = [0, 96], sizes = [8, 32], strides = [1, 1]} : vector<8x128xf32> to vector<8x32xf32>
    %364 = arith.mulf %361, %312 : vector<8x32xf32>
    %365 = arith.mulf %360, %363 : vector<8x32xf32>
    %366 = arith.addf %364, %365 : vector<8x32xf32>
    %367 = math.tanh %366 : vector<8x32xf32>
    %368 = arith.mulf %362, %367 : vector<8x32xf32>
    %369 = tpu.concatenate %368, %332 in 1 : vector<8x32xf32>, vector<8x32xf32> -> vector<8x64xf32>
    %cst_63 = arith.constant dense<0.000000e+00> : vector<8x128xf32>
    %370 = tpu.matmul %369, %2, %cst_63 {dimension_numbers = #tpu.dot_dimension_numbers<[1], [0], [0], [1], [0, 0, 1, 1], [], []>} : vector<8x64xf32>, vector<64x128xf32>, vector<8x128xf32> -> vector<8x128xf32>
    %371 = arith.addf %370, %11 : vector<8x128xf32>
    %372 = arith.negf %371 : vector<8x128xf32>
    %373 = math.exp %372 : vector<8x128xf32>
    %cst_64 = arith.constant 1.000000e+00 : f32
    %374 = vector.broadcast %cst_64 : f32 to vector<8x128xf32>
    %375 = arith.addf %374, %373 : vector<8x128xf32>
    %376 = arith.divf %374, %375 : vector<8x128xf32>
    %377 = math.tanh %371 : vector<8x128xf32>
    %378 = vector.extract_strided_slice %376 {offsets = [0, 0], sizes = [8, 32], strides = [1, 1]} : vector<8x128xf32> to vector<8x32xf32>
    %379 = vector.extract_strided_slice %376 {offsets = [0, 32], sizes = [8, 32], strides = [1, 1]} : vector<8x128xf32> to vector<8x32xf32>
    %380 = vector.extract_strided_slice %376 {offsets = [0, 64], sizes = [8, 32], strides = [1, 1]} : vector<8x128xf32> to vector<8x32xf32>
    %381 = vector.extract_strided_slice %377 {offsets = [0, 96], sizes = [8, 32], strides = [1, 1]} : vector<8x128xf32> to vector<8x32xf32>
    %382 = arith.mulf %379, %330 : vector<8x32xf32>
    %383 = arith.mulf %378, %381 : vector<8x32xf32>
    %384 = arith.addf %382, %383 : vector<8x32xf32>
    %385 = math.tanh %384 : vector<8x32xf32>
    %386 = arith.mulf %380, %385 : vector<8x32xf32>
    %387 = tpu.concatenate %386, %350 in 1 : vector<8x32xf32>, vector<8x32xf32> -> vector<8x64xf32>
    %cst_65 = arith.constant dense<0.000000e+00> : vector<8x128xf32>
    %388 = tpu.matmul %387, %3, %cst_65 {dimension_numbers = #tpu.dot_dimension_numbers<[1], [0], [0], [1], [0, 0, 1, 1], [], []>} : vector<8x64xf32>, vector<64x128xf32>, vector<8x128xf32> -> vector<8x128xf32>
    %389 = arith.addf %388, %14 : vector<8x128xf32>
    %390 = arith.negf %389 : vector<8x128xf32>
    %391 = math.exp %390 : vector<8x128xf32>
    %cst_66 = arith.constant 1.000000e+00 : f32
    %392 = vector.broadcast %cst_66 : f32 to vector<8x128xf32>
    %393 = arith.addf %392, %391 : vector<8x128xf32>
    %394 = arith.divf %392, %393 : vector<8x128xf32>
    %395 = math.tanh %389 : vector<8x128xf32>
    %396 = vector.extract_strided_slice %394 {offsets = [0, 0], sizes = [8, 32], strides = [1, 1]} : vector<8x128xf32> to vector<8x32xf32>
    %397 = vector.extract_strided_slice %394 {offsets = [0, 32], sizes = [8, 32], strides = [1, 1]} : vector<8x128xf32> to vector<8x32xf32>
    %398 = vector.extract_strided_slice %394 {offsets = [0, 64], sizes = [8, 32], strides = [1, 1]} : vector<8x128xf32> to vector<8x32xf32>
    %399 = vector.extract_strided_slice %395 {offsets = [0, 96], sizes = [8, 32], strides = [1, 1]} : vector<8x128xf32> to vector<8x32xf32>
    %400 = arith.mulf %397, %348 : vector<8x32xf32>
    %401 = arith.mulf %396, %399 : vector<8x32xf32>
    %402 = arith.addf %400, %401 : vector<8x32xf32>
    %403 = math.tanh %402 : vector<8x32xf32>
    %404 = arith.mulf %398, %403 : vector<8x32xf32>
    %405 = vector.extract_strided_slice %8 {offsets = [56, 0], sizes = [8, 128], strides = [1, 1]} : vector<64x128xf32> to vector<8x128xf32>
    %cst_67 = arith.constant dense<0.000000e+00> : vector<8x128xf32>
    %406 = tpu.matmul %368, %1, %cst_67 {dimension_numbers = #tpu.dot_dimension_numbers<[1], [0], [0], [1], [0, 0, 1, 1], [], []>} : vector<8x32xf32>, vector<32x128xf32>, vector<8x128xf32> -> vector<8x128xf32>
    %407 = arith.addf %405, %406 : vector<8x128xf32>
    %408 = arith.negf %407 : vector<8x128xf32>
    %409 = math.exp %408 : vector<8x128xf32>
    %cst_68 = arith.constant 1.000000e+00 : f32
    %410 = vector.broadcast %cst_68 : f32 to vector<8x128xf32>
    %411 = arith.addf %410, %409 : vector<8x128xf32>
    %412 = arith.divf %410, %411 : vector<8x128xf32>
    %413 = math.tanh %407 : vector<8x128xf32>
    %414 = vector.extract_strided_slice %412 {offsets = [0, 0], sizes = [8, 32], strides = [1, 1]} : vector<8x128xf32> to vector<8x32xf32>
    %415 = vector.extract_strided_slice %412 {offsets = [0, 32], sizes = [8, 32], strides = [1, 1]} : vector<8x128xf32> to vector<8x32xf32>
    %416 = vector.extract_strided_slice %412 {offsets = [0, 64], sizes = [8, 32], strides = [1, 1]} : vector<8x128xf32> to vector<8x32xf32>
    %417 = vector.extract_strided_slice %413 {offsets = [0, 96], sizes = [8, 32], strides = [1, 1]} : vector<8x128xf32> to vector<8x32xf32>
    %418 = arith.mulf %415, %366 : vector<8x32xf32>
    %419 = arith.mulf %414, %417 : vector<8x32xf32>
    %420 = arith.addf %418, %419 : vector<8x32xf32>
    %421 = math.tanh %420 : vector<8x32xf32>
    %422 = arith.mulf %416, %421 : vector<8x32xf32>
    %423 = tpu.concatenate %422, %386 in 1 : vector<8x32xf32>, vector<8x32xf32> -> vector<8x64xf32>
    %cst_69 = arith.constant dense<0.000000e+00> : vector<8x128xf32>
    %424 = tpu.matmul %423, %2, %cst_69 {dimension_numbers = #tpu.dot_dimension_numbers<[1], [0], [0], [1], [0, 0, 1, 1], [], []>} : vector<8x64xf32>, vector<64x128xf32>, vector<8x128xf32> -> vector<8x128xf32>
    %425 = arith.addf %424, %11 : vector<8x128xf32>
    %426 = arith.negf %425 : vector<8x128xf32>
    %427 = math.exp %426 : vector<8x128xf32>
    %cst_70 = arith.constant 1.000000e+00 : f32
    %428 = vector.broadcast %cst_70 : f32 to vector<8x128xf32>
    %429 = arith.addf %428, %427 : vector<8x128xf32>
    %430 = arith.divf %428, %429 : vector<8x128xf32>
    %431 = math.tanh %425 : vector<8x128xf32>
    %432 = vector.extract_strided_slice %430 {offsets = [0, 0], sizes = [8, 32], strides = [1, 1]} : vector<8x128xf32> to vector<8x32xf32>
    %433 = vector.extract_strided_slice %430 {offsets = [0, 32], sizes = [8, 32], strides = [1, 1]} : vector<8x128xf32> to vector<8x32xf32>
    %434 = vector.extract_strided_slice %430 {offsets = [0, 64], sizes = [8, 32], strides = [1, 1]} : vector<8x128xf32> to vector<8x32xf32>
    %435 = vector.extract_strided_slice %431 {offsets = [0, 96], sizes = [8, 32], strides = [1, 1]} : vector<8x128xf32> to vector<8x32xf32>
    %436 = arith.mulf %433, %384 : vector<8x32xf32>
    %437 = arith.mulf %432, %435 : vector<8x32xf32>
    %438 = arith.addf %436, %437 : vector<8x32xf32>
    %439 = math.tanh %438 : vector<8x32xf32>
    %440 = arith.mulf %434, %439 : vector<8x32xf32>
    %441 = tpu.concatenate %440, %404 in 1 : vector<8x32xf32>, vector<8x32xf32> -> vector<8x64xf32>
    %cst_71 = arith.constant dense<0.000000e+00> : vector<8x128xf32>
    %442 = tpu.matmul %441, %3, %cst_71 {dimension_numbers = #tpu.dot_dimension_numbers<[1], [0], [0], [1], [0, 0, 1, 1], [], []>} : vector<8x64xf32>, vector<64x128xf32>, vector<8x128xf32> -> vector<8x128xf32>
    %443 = arith.addf %442, %14 : vector<8x128xf32>
    %444 = arith.negf %443 : vector<8x128xf32>
    %445 = math.exp %444 : vector<8x128xf32>
    %cst_72 = arith.constant 1.000000e+00 : f32
    %446 = vector.broadcast %cst_72 : f32 to vector<8x128xf32>
    %447 = arith.addf %446, %445 : vector<8x128xf32>
    %448 = arith.divf %446, %447 : vector<8x128xf32>
    %449 = math.tanh %443 : vector<8x128xf32>
    %450 = vector.extract_strided_slice %448 {offsets = [0, 0], sizes = [8, 32], strides = [1, 1]} : vector<8x128xf32> to vector<8x32xf32>
    %451 = vector.extract_strided_slice %448 {offsets = [0, 32], sizes = [8, 32], strides = [1, 1]} : vector<8x128xf32> to vector<8x32xf32>
    %452 = vector.extract_strided_slice %448 {offsets = [0, 64], sizes = [8, 32], strides = [1, 1]} : vector<8x128xf32> to vector<8x32xf32>
    %453 = vector.extract_strided_slice %449 {offsets = [0, 96], sizes = [8, 32], strides = [1, 1]} : vector<8x128xf32> to vector<8x32xf32>
    %454 = arith.mulf %451, %402 : vector<8x32xf32>
    %455 = arith.mulf %450, %453 : vector<8x32xf32>
    %456 = arith.addf %454, %455 : vector<8x32xf32>
    %457 = math.tanh %456 : vector<8x32xf32>
    %458 = arith.mulf %452, %457 : vector<8x32xf32>
    %c3_73 = arith.constant 3 : index
    %c0_74 = arith.constant 0 : index
    %459 = vector.load %arg3[%c3_73, %c0_74] : memref<4x128xf32, #tpu.memory_space<vmem>>, vector<1x32xf32>
    %c3_75 = arith.constant 3 : index
    %c32 = arith.constant 32 : index
    %460 = vector.load %arg3[%c3_75, %c32] : memref<4x128xf32, #tpu.memory_space<vmem>>, vector<1x1xf32>
    %461 = vector.broadcast %459 : vector<1x32xf32> to vector<8x32xf32>
    %462 = arith.mulf %458, %461 : vector<8x32xf32>
    %cst_76 = arith.constant dense<0.000000e+00> : vector<8xf32>
    %463 = vector.multi_reduction <add>, %462, %cst_76 [1] : vector<8x32xf32> to vector<8xf32>
    %464 = vector.shape_cast %463 : vector<8xf32> to vector<8x1xf32>
    %465 = vector.broadcast %460 : vector<1x1xf32> to vector<8x1xf32>
    %466 = arith.addf %464, %465 : vector<8x1xf32>
    %467 = vector.shape_cast %466 : vector<8x1xf32> to vector<8x1xf32>
    %468 = vector.broadcast %467 : vector<8x1xf32> to vector<8x128xf32>
    %c0_77 = arith.constant 0 : index
    %c0_78 = arith.constant 0 : index
    %469 = vector.load %arg4[%c0_77, %c0_78] : memref<8x128xf32, #tpu.memory_space<vmem>>, vector<8x128xf32>
    tpu.vector_store %arg4[%c0_77, %c0_78], %468 {strides = array<i32>} : memref<8x128xf32, #tpu.memory_space<vmem>>, vector<8x128xf32>,
    return
  }
}

</mosaic_0001>

<bundles_post_ra>
// kernel: tpu_custom_call.1
= control target key start
LH: loop header
LB: loop body
LE: loop exit
PB: predicated region body
PF: predicated region fallthrough
CT: control target
= control target key end

     0   :  { %9 = vsyncpa [#allocation3], 0  ;;  %s4527_s0 = inlined_call_operand.vmem [shape: f32[64,8], index: 0, kind: input, shape index: {}]   ;;  %s4528_s1 = inlined_call_operand.vmem [shape: f32[6,8,32], index: 1, kind: input, shape index: {}]   ;;  %s4529_s2 = inlined_call_operand.hbm [shape: f32[168,128], index: 2, kind: input, shape index: {}]   ;;  %s4530_s3 = inlined_call_operand.vmem [shape: f32[4,128], index: 3, kind: input, shape index: {}]   ;;  %s4531_s4 = inlined_call_operand.hbm [shape: f32[8,128], index: 4, kind: output, shape index: {}]  }
   0x1   :  { %10 = vsyncpa [#allocation4], 0  ;;  %s3670_s15 = smov [#allocation2]  }
   0x2   :  { %s20_s16 = sshll.u32 %s3670_s15, 4  ;;  %s21_s16 = int_to_ptr.vmem [resolvable:$true] %s20_s16 }
   0x3   :  { %s3634_s17 = scalar_lea.vmem %s21_s16, 2688  ;;  %p3639_p1 = scmp.lt.s32.totalorder %s21_s16, %s21_s16 }
   0x4   :  { %p3635_p0 = scmp.ne.s32.totalorder %s21_s16, %s3634_s17  ;;  %p3640_p2 = scmp.lt.s32.totalorder %s3634_s17, %s3634_s17 }
   0x6   :  { %p3641_p3 = por %p3640_p2, %p3639_p1 }
   0x8   :  { %p3642_p4 = pnand %p3641_p3, %p3635_p0 }
   0xa   :  { %3645 = shalt.err (!%p3642_p4)
}
   0xb   :  { %s3671_s18 = smov 128   ;;  %s3672_s19 = smov 8  }
   0xc   :  { %26 = dma.hbm_to_vmem [thread:$0]  %s4529_s2, 2688, %s21_s16, [#allocation3], %s3671_s18, %s3671_s18, %s3672_s19  }
   0xd   :  { %3666 = dma.done.wait [#allocation3], 2688  }
   0xe   :  { %3667 = vsyncadd [#allocation3], 4294964608  ;;  %v3673_v0 = vmov 0.0   ;;  %vm3674_vm0 = vmmov 0   ;;  %vm66_vm1 = vcmask 64512   ;;  %v32_v1 = vld [vmem:[#allocation2] sm:$0xff] }
   0xf   :  { %3008 = vmatprep.subr.mxu1 %v3673_v0  ;;  %3016 = vmatprep.mubr.msk.f32.mxu1 %vm3674_vm0, %v3673_v0  ;;  %v3711_v2 = vld [vmem:[#allocation2 + $0x20] sm:$0xff]  ;;  %v54_v4 = vld [vmem:[%s4527_s0 + $0x8] sm:$0xff]  ;;  %v3720_v5 = vld [vmem:[#allocation2 + $0x18] sm:$0xff]  ;;  %vm217_vm2 = vcmask 261120   ;;  %s3675_s29 = smov 32   ;;  %vm329_vm3 = vcmask 523264  }
  0x10   :  { %v53_v3 = vld [vmem:[%s4527_s0] sm:$0xff]  ;;  %2994 = vmatprep.subr.mxu0 %v32_v1  ;;  %3009 = vmatpush3.msra.mxu1 %v3711_v2  ;;  %v3725_v6 = vld [vmem:[#allocation2 + $0x10] sm:$0xff]  ;;  %v3730_v7 = vld [vmem:[#allocation2 + $0x8] sm:$0xff]  ;;  %s3677_s25 = smov 96  }
  0x11   :  { %2995 = vmatpush3.msra.mxu0 %v32_v1  ;;  %2996 = vmatprep.mubr.msk.f32.mxu0 %vm66_vm1, %v53_v3  ;;  %v206_v8 = vld [vmem:[%s4528_s1] sm:$0xff]  ;;  %v2749_v17 = vld [vmem:[%s4528_s1 + $0x18] sm:$0xff]  ;;  %v55_v29 = vld [vmem:[%s4527_s0 + $0x10] sm:$0xff] }
  0x12   :  { %3010 = vmatprep.subr.mxu1 %v3673_v0  ;;  %2997 = vmatmul.mubr.msk.f32.vlgmr.msra.gmra.mxu0 %vm66_vm1, %v54_v4  ;;  %v3747_v10 = vld [vmem:[%s4530_s3] ss:$0 sm:$0xff]  ;;  %v56_v30 = vld [vmem:[%s4527_s0 + $0x18] sm:$0xff]  ;;  %v3776_v33 = vld [vmem:[#allocation2 + $0x50] sm:$0xff] }
  0x13   :  { %3011 = vmatpush3.msra.mxu1 %v3720_v5  ;;  %3019 = vmatprep.subr.mxu0 %v3673_v0  ;;  %v3759_v28 = vld [vmem:[#allocation2 + $0x60] sm:$0xff]  ;;  %v3769_v31 = vld [vmem:[#allocation2 + $0x58] sm:$0xff]  ;;  %v58_v34 = vld [vmem:[%s4527_s0 + $0x28] sm:$0xff] }
  0x14   :  { %3012 = vmatprep.subr.mxu1 %v3673_v0  ;;  %3020 = vmatpush3.msra.mxu0 %v3759_v28  ;;  %v57_v32 = vld [vmem:[%s4527_s0 + $0x20] sm:$0xff]  ;;  %v3784_v35 = vld [vmem:[#allocation2 + $0x48] sm:$0xff]  ;;  %v59_v36 = vld [vmem:[%s4527_s0 + $0x30] sm:$0xff] }
  0x15   :  { %3013 = vmatpush3.msra.mxu1 %v3725_v6  ;;  %2999 = vmatprep.mubr.msk.f32.mxu0 %vm66_vm1, %v55_v29  ;;  %v3792_v37 = vld [vmem:[#allocation2 + $0x40] sm:$0xff]  ;;  %v60_v38 = vld [vmem:[%s4527_s0 + $0x38] sm:$0xff]  ;;  %v3805_v41 = vld [vmem:[#allocation2 + $0x30] sm:$0xff]  ;;  %s3676_s0 = smov 64  }
  0x16   :  { %3014 = vmatprep.subr.mxu1 %v3673_v0  ;;  %3021 = vmatprep.subr.mxu0 %v3673_v0  ;;  %v3800_v39 = vld [vmem:[#allocation2 + $0x38] sm:$0xff]  ;;  %v2747_v42 = vld [vmem:[%s4528_s1 + $0x8] sm:$0xff]  ;;  %v3853_v55 = vld [vmem:[%s4530_s3 + $0x1] ss:$0 sm:$0xff] }
  0x17   :  { %3015 = vmatpush3.msra.mxu1 %v3730_v7  ;;  %3000 = vmatmul.mubr.msk.f32.gmra.mxu0 %vm66_vm1, %v56_v30  ;;  %v3813_v43 = vld [vmem:[#allocation2 + $0x28] sm:$0xff]  ;;  %v2750_v1 = vld [vmem:[%s4528_s1 + $0x20] sm:$0xff]  ;;  %v3883_v30 = vld [vmem:[#allocation2 + $0x98] sm:$0xff] }
  0x18   :  { %3017 = vmatmul.mubr.msk.f32.vlgmr.msra.gmra.mxu1 %vm217_vm2, %v206_v8  ;;  %3038 = vmatprep.subr.mxu1 %v3673_v0  ;;  %v3881_v29 = vld [vmem:[#allocation2 + $0xa0] sm:$0xff] }
  0x19   :  { %3054 = vmatprep.mubr.msk.f32.mxu1 %vm3674_vm0, %v3673_v0  ;;  %3022 = vmatpush3.msra.mxu0 %v3769_v31 }
  0x1a   :  { %3002 = vmatprep.mubr.msk.f32.mxu0 %vm66_vm1, %v57_v32  ;;  %3023 = vmatprep.subr.mxu0 %v3673_v0 }
  0x1b   :  { %3024 = vmatpush3.msra.mxu0 %v3776_v33  ;;  %3039 = vmatpush3.msra.mxu1 %v3881_v29 }
  0x1c   :  { %3025 = vmatprep.subr.mxu0 %v3673_v0  ;;  %3003 = vmatmul.mubr.msk.f32.gmra.mxu0 %vm66_vm1, %v58_v34  ;;  %v3888_v34 = vld [vmem:[#allocation2 + $0x90] sm:$0xff] }
  0x1d   :  { %3026 = vmatpush3.msra.mxu0 %v3784_v35  ;;  %3005 = vmatprep.mubr.msk.f32.mxu0 %vm66_vm1, %v59_v36  ;;  %v3900_v36 = vld [vmem:[#allocation2 + $0x80] sm:$0xff] }
  0x1e   :  { %3027 = vmatprep.subr.mxu0 %v3673_v0  ;;  %3040 = vmatprep.subr.mxu1 %v3673_v0 }
  0x1f   :  { %3028 = vmatpush3.msra.mxu0 %v3792_v37  ;;  %3041 = vmatpush3.msra.mxu1 %v3883_v30 }
  0x20   :  { %3029 = vmatprep.subr.mxu0 %v3673_v0  ;;  %3006 = vmatmul.mubr.msk.f32.gmra.mxu0 %vm66_vm1, %v60_v38  ;;  %v3906_v38 = vld [vmem:[#allocation2 + $0x78] sm:$0xff] }
  0x21   :  { %3030 = vmatpush3.msra.mxu0 %v3800_v39  ;;  %3035 = vmatprep.mubr.msk.f32.mxu0 %vm3674_vm0, %v3673_v0 }
  0x22   :  { %3031 = vmatprep.subr.mxu0 %v3673_v0  ;;  %3042 = vmatprep.subr.mxu1 %v3673_v0 }
  0x23   :  { %3032 = vmatpush3.msra.mxu0 %v3805_v41  ;;  %3043 = vmatpush3.msra.mxu1 %v3888_v34 }
  0x24   :  { %3033 = vmatprep.subr.mxu0 %v3673_v0  ;;  %3044 = vmatprep.subr.mxu1 %v3673_v0 }
  0x25   :  { %3034 = vmatpush3.msra.mxu0 %v3813_v43 }
  0x26   :  { %3057 = vmatprep.subr.mxu0 %v3673_v0 }
  0xd2   :  { %v3742_v9 = vpop.f32.mrf.mxu0 }
  0xd3   :  { %v163_v59 = vadd.f32 %v3742_v9, %v3747_v10 }
  0xd4   :  { %v157_v11 = vpop.f32.mrf.mxu0 }
  0xd5   :  { %v158_v12 = vadd.f32 %v3747_v10, %v157_v11 }
  0xd7   :  { %v3838_v49 = vpop.f32.mrf.mxu0 }
  0xd8   :  { %v287_v13 = vpop.f32.mrf.mxu1 }
  0xd9   :  { %v291_v14 = vadd.f32 %v287_v13, %v158_v12  ;;  %v3840_v50 = vpop.f32.mrf.mxu0 }
  0xda   :  { %v3018_v15 = vpop.f32.mrf.mxu1 }
  0xdb   :  { %3411 = vtanh.f32 %v291_v14  ;;  %v2753_v18 = vmul.f32 -1.442695, %v291_v14 }
  0xdc   :  { %v3842_v51 = vpop.f32.mrf.mxu0 }
  0xdd   :  { %3413 = vpow2.f32 %v2753_v18 }
  0xde   :  { %v3844_v52 = vpop.f32.mrf.mxu0 }
  0xe0   :  { %v3846_v53 = vpop.f32.mrf.mxu0 }
  0xe2   :  { %v3848_v54 = vpop.f32.mrf.mxu0 }
  0xe8   :  { %v3412_v16 = vpop.eup %3411 }
  0xe9   :  { %305 = vrot.lane.b32.xlu0 %v3412_v16, %s3675_s29 }
  0xea   :  { %v3414_v19 = vpop.eup %3413 }
  0xeb   :  { %v295_v20 = vadd.f32 1.0, %v3414_v19 }
  0xed   :  { %300 = vrot.lane.b32.xlu0 %v2749_v17, %s3675_s29  ;;  %3415 = vrcp.f32 %v295_v20 }
  0xfa   :  { %v3416_v21 = vpop.eup %3415 }
 0x15b   :  { %v306_v22 = vpop.permute.xlu0 %305 }
 0x15c   :  { %v308_v23 = vmul.f32 %v3416_v21, %v306_v22 }
 0x15e   :  { %310 = vrot.lane.b32.xlu1 %v308_v23, %s3675_s29 }
 0x15f   :  { %v301_v24 = vpop.permute.xlu0 %300 }
 0x160   :  { %v303_v25 = vmul.f32 %v3416_v21, %v301_v24 }
 0x1d0   :  { %v311_v26 = vpop.permute.xlu1 %310 }
 0x1d1   :  { %v3756_v27 = vadd.f32 %v311_v26, %v303_v25 }
 0x1d3   :  { %3417 = vtanh.f32 %v3756_v27 }
 0x1e0   :  { %v3418_v40 = vpop.eup %3417 }
 0x1e1   :  { %316 = vrot.lane.b32.xlu1 %v3418_v40, %s3675_s29 }
 0x1e5   :  { %325 = vrot.lane.b32.xlu1 %v2747_v42, %s3675_s29  ;;  %v3912_v42 = vld [vmem:[#allocation2 + $0x70] sm:$0xff] }
 0x253   :  { %v317_v44 = vpop.permute.xlu1 %316 }
 0x254   :  { %v319_v45 = vmul.f32 %v3416_v21, %v317_v44  ;;  %v2748_v44 = vld [vmem:[%s4528_s1 + $0x10] sm:$0xff] }
 0x256   :  { %321 = vrot.lane.b32.xlu0 %v319_v45, %s3676_s0  ;;  %v3921_v45 = vld [vmem:[#allocation2 + $0x68] sm:$0xff] }
 0x257   :  { %v326_v46 = vpop.permute.xlu1 %325 }
 0x2c8   :  { %v322_v47 = vpop.permute.xlu0 %321 }
 0x2c9   :  { %v328_v48 = vsel %vm217_vm2, %v322_v47, %v326_v46 }
 0x2ca   :  { %3036 = vmatmul.mubr.msk.f32.vlgmr.msra.gmra.mxu0 %vm329_vm3, %v328_v48 }
 0x2cb   :  { %3058 = vmatpush3.msra.mxu0 %v3711_v2  ;;  %3065 = vmatprep.mubr.msk.f32.mxu0 %vm3674_vm0, %v3673_v0 }
 0x2cc   :  { %3059 = vmatprep.subr.mxu0 %v3673_v0 }
 0x2cd   :  { %3060 = vmatpush3.msra.mxu0 %v3720_v5 }
 0x2ce   :  { %3061 = vmatprep.subr.mxu0 %v3673_v0 }
 0x2cf   :  { %3062 = vmatpush3.msra.mxu0 %v3725_v6 }
 0x2d0   :  { %3063 = vmatprep.subr.mxu0 %v3673_v0 }
 0x2d1   :  { %3064 = vmatpush3.msra.mxu0 %v3730_v7 }
 0x2d2   :  { %3066 = vmatmul.mubr.msk.f32.vlgmr.msra.gmra.mxu0 %vm217_vm2, %v322_v47  ;;  %3087 = vmatprep.subr.mxu0 %v3673_v0 }
 0x2d3   :  { %3103 = vmatprep.mubr.msk.f32.mxu0 %vm3674_vm0, %v3673_v0  ;;  %3088 = vmatpush3.msra.mxu0 %v3881_v29 }
 0x2d4   :  { %3089 = vmatprep.subr.mxu0 %v3673_v0 }
 0x2d5   :  { %3090 = vmatpush3.msra.mxu0 %v3883_v30 }
 0x2d6   :  { %3091 = vmatprep.subr.mxu0 %v3673_v0 }
 0x2d7   :  { %3092 = vmatpush3.msra.mxu0 %v3888_v34 }
 0x2d8   :  { %3093 = vmatprep.subr.mxu0 %v3673_v0 }
 0x38a   :  { %v399_v56 = vpop.f32.mrf.mxu0 }
 0x38b   :  { %v400_v57 = vadd.f32 %v3853_v55, %v399_v56 }
 0x38c   :  { %v3037_v58 = vpop.f32.mrf.mxu0 }
 0x38d   :  { %3419 = vtanh.f32 %v400_v57  ;;  %v2755_v4 = vmul.f32 -1.442695, %v400_v57 }
 0x392   :  { %v609_v60 = vpop.f32.mrf.mxu0 }
 0x393   :  { %v613_v61 = vadd.f32 %v609_v60, %v163_v59 }
 0x394   :  { %v3067_v62 = vpop.f32.mrf.mxu0 }
 0x395   :  { %3421 = vtanh.f32 %v613_v61  ;;  %v2759_v8 = vmul.f32 -1.442695, %v613_v61 }
 0x396   :  { %3423 = vpow2.f32 %v2755_v4 }
 0x397   :  { %3425 = vpow2.f32 %v2759_v8 }
 0x39a   :  { %v3420_v63 = vpop.eup %3419 }
 0x39b   :  { %416 = vrot.lane.b32.xlu0 %v3420_v63, %s3675_s29  ;;  %v3994_v63 = vld [vmem:[%s4530_s3 + $0x2] ss:$0 sm:$0xff] }
 0x39f   :  { %411 = vrot.lane.b32.xlu0 %v2750_v1, %s3675_s29 }
 0x3a2   :  { %v3422_v3 = vpop.eup %3421 }
 0x3a3   :  { %623 = vrot.lane.b32.xlu1 %v3422_v3, %s3675_s29  ;;  %v3424_v9 = vpop.eup %3423 }
 0x3a4   :  { %v406_v11 = vadd.f32 1.0, %v3424_v9  ;;  %v3426_v12 = vpop.eup %3425 }
 0x3a5   :  { %v617_v13 = vadd.f32 1.0, %v3426_v12 }
 0x3a6   :  { %3427 = vrcp.f32 %v406_v11 }
 0x3a7   :  { %3429 = vrcp.f32 %v617_v13  ;;  %v168_v13 = vadd.f32 %v3747_v10, %v3840_v50 }
 0x3b3   :  { %v3864_v14 = vpop.eup %3427 }
 0x3b4   :  { %v3868_v17 = vpop.eup %3429 }
 0x3b5   :  { %v621_v24 = vmul.f32 %v3868_v17, %v3756_v27  ;;  %v3894_v27 = vld [vmem:[#allocation2 + $0x88] sm:$0xff] }
 0x3b6   :  { %3045 = vmatpush3.msra.mxu1 %v3894_v27  ;;  %3094 = vmatpush3.msra.mxu0 %v3894_v27 }
 0x3b7   :  { %3046 = vmatprep.subr.mxu1 %v3673_v0  ;;  %3095 = vmatprep.subr.mxu0 %v3673_v0 }
 0x3b8   :  { %3047 = vmatpush3.msra.mxu1 %v3900_v36  ;;  %3096 = vmatpush3.msra.mxu0 %v3900_v36 }
 0x3b9   :  { %3048 = vmatprep.subr.mxu1 %v3673_v0  ;;  %3097 = vmatprep.subr.mxu0 %v3673_v0 }
 0x3ba   :  { %3049 = vmatpush3.msra.mxu1 %v3906_v38  ;;  %3098 = vmatpush3.msra.mxu0 %v3906_v38 }
 0x3bb   :  { %3050 = vmatprep.subr.mxu1 %v3673_v0  ;;  %3099 = vmatprep.subr.mxu0 %v3673_v0 }
 0x3bc   :  { %3051 = vmatpush3.msra.mxu1 %v3912_v42  ;;  %3100 = vmatpush3.msra.mxu0 %v3912_v42 }
 0x3bd   :  { %3052 = vmatprep.subr.mxu1 %v3673_v0  ;;  %3101 = vmatprep.subr.mxu0 %v3673_v0 }
 0x3be   :  { %3053 = vmatpush3.msra.mxu1 %v3921_v45  ;;  %3102 = vmatpush3.msra.mxu0 %v3921_v45 }
 0x3bf   :  { %3068 = vmatprep.subr.mxu1 %v3673_v0  ;;  %3117 = vmatprep.subr.mxu0 %v3673_v0 }
 0x40d   :  { %v417_v15 = vpop.permute.xlu0 %416 }
 0x40e   :  { %v419_v16 = vmul.f32 %v3864_v14, %v417_v15 }
 0x410   :  { %421 = vrot.lane.b32.xlu1 %v419_v16, %s3675_s29 }
 0x411   :  { %v412_v20 = vpop.permute.xlu0 %411 }
 0x412   :  { %v414_v21 = vmul.f32 %v3864_v14, %v412_v20 }
 0x415   :  { %v624_v18 = vpop.permute.xlu1 %623 }
 0x416   :  { %v626_v19 = vmul.f32 %v3868_v17, %v624_v18  ;;  %v2751_v18 = vld [vmem:[%s4528_s1 + $0x28] sm:$0xff] }
 0x418   :  { %628 = vrot.lane.b32.xlu0 %v626_v19, %s3675_s29 }
 0x482   :  { %v422_v22 = vpop.permute.xlu1 %421 }
 0x483   :  { %v3873_v23 = vadd.f32 %v422_v22, %v414_v21 }
 0x485   :  { %3431 = vtanh.f32 %v3873_v23 }
 0x48a   :  { %v629_v25 = vpop.permute.xlu0 %628 }
 0x48b   :  { %v3878_v26 = vadd.f32 %v629_v25, %v621_v24 }
 0x48d   :  { %3433 = vtanh.f32 %v3878_v26 }
 0x492   :  { %v3432_v32 = vpop.eup %3431 }
 0x493   :  { %427 = vrot.lane.b32.xlu1 %v3432_v32, %s3675_s29 }
 0x49a   :  { %v3434_v40 = vpop.eup %3433 }
 0x49b   :  { %634 = vrot.lane.b32.xlu0 %v3434_v40, %s3675_s29 }
 0x49f   :  { %436 = vrot.lane.b32.xlu0 %v2748_v44, %s3675_s29 }
 0x505   :  { %v428_v46 = vpop.permute.xlu1 %427 }
 0x506   :  { %v430_v47 = vmul.f32 %v3864_v14, %v428_v46 }
 0x508   :  { %432 = vrot.lane.b32.xlu1 %v430_v47, %s3676_s0  ;;  %642 = vrot.lane.b32.xlu0 %v430_v47, %s3677_s25 }
 0x50d   :  { %v635_v48 = vpop.permute.xlu0 %634 }
 0x50e   :  { %v637_v56 = vmul.f32 %v3868_v17, %v635_v48 }
 0x510   :  { %639 = vrot.lane.b32.xlu1 %v637_v56, %s3676_s0 }
 0x511   :  { %v437_v57 = vpop.permute.xlu0 %436 }
 0x57a   :  { %v433_v58 = vpop.permute.xlu1 %432  ;;  %v643_v61 = vpop.permute.xlu0 %642 }
 0x57b   :  { %v439_v59 = vsel %vm217_vm2, %v433_v58, %v437_v57 }
 0x57c   :  { %3055 = vmatmul.mubr.msk.f32.vlgmr.msra.gmra.mxu1 %vm329_vm3, %v439_v59 }
 0x57d   :  { %3069 = vmatpush3.msra.mxu1 %v3759_v28  ;;  %3084 = vmatprep.mubr.msk.f32.mxu1 %vm3674_vm0, %v3673_v0 }
 0x57e   :  { %3070 = vmatprep.subr.mxu1 %v3673_v0 }
 0x57f   :  { %3071 = vmatpush3.msra.mxu1 %v3769_v31 }
 0x580   :  { %3072 = vmatprep.subr.mxu1 %v3673_v0 }
 0x581   :  { %3073 = vmatpush3.msra.mxu1 %v3776_v33 }
 0x582   :  { %3074 = vmatprep.subr.mxu1 %v3673_v0  ;;  %v640_v60 = vpop.permute.xlu1 %639 }
 0x583   :  { %3075 = vmatpush3.msra.mxu1 %v3784_v35  ;;  %v645_v62 = vsel %vm217_vm2, %v640_v60, %v643_v61 }
 0x584   :  { %3076 = vmatprep.subr.mxu1 %v3673_v0 }
 0x585   :  { %3077 = vmatpush3.msra.mxu1 %v3792_v37 }
 0x586   :  { %3078 = vmatprep.subr.mxu1 %v3673_v0 }
 0x587   :  { %3079 = vmatpush3.msra.mxu1 %v3800_v39 }
 0x588   :  { %3080 = vmatprep.subr.mxu1 %v3673_v0 }
 0x589   :  { %3081 = vmatpush3.msra.mxu1 %v3805_v41 }
 0x58a   :  { %3082 = vmatprep.subr.mxu1 %v3673_v0 }
 0x58b   :  { %3083 = vmatpush3.msra.mxu1 %v3813_v43 }
 0x58c   :  { %3085 = vmatmul.mubr.msk.f32.vlgmr.msra.gmra.mxu1 %vm329_vm3, %v645_v62  ;;  %3106 = vmatprep.subr.mxu1 %v3673_v0 }
 0x58d   :  { %3107 = vmatpush3.msra.mxu1 %v3711_v2  ;;  %3114 = vmatprep.mubr.msk.f32.mxu1 %vm3674_vm0, %v3673_v0 }
 0x58e   :  { %3108 = vmatprep.subr.mxu1 %v3673_v0 }
 0x58f   :  { %3109 = vmatpush3.msra.mxu1 %v3720_v5 }
 0x590   :  { %3110 = vmatprep.subr.mxu1 %v3673_v0 }
 0x591   :  { %3111 = vmatpush3.msra.mxu1 %v3725_v6 }
 0x592   :  { %3112 = vmatprep.subr.mxu1 %v3673_v0 }
 0x593   :  { %3113 = vmatpush3.msra.mxu1 %v3730_v7 }
 0x594   :  { %3115 = vmatmul.mubr.msk.f32.vlgmr.msra.gmra.mxu1 %vm217_vm2, %v640_v60  ;;  %3136 = vmatprep.subr.mxu1 %v3673_v0 }
 0x595   :  { %3137 = vmatpush3.msra.mxu1 %v3881_v29  ;;  %3152 = vmatprep.mubr.msk.f32.mxu1 %vm3674_vm0, %v3673_v0 }
 0x596   :  { %3138 = vmatprep.subr.mxu1 %v3673_v0 }
 0x597   :  { %3139 = vmatpush3.msra.mxu1 %v3883_v30 }
 0x598   :  { %3140 = vmatprep.subr.mxu1 %v3673_v0 }
 0x599   :  { %3141 = vmatpush3.msra.mxu1 %v3888_v34 }
 0x59a   :  { %3142 = vmatprep.subr.mxu1 %v3673_v0 }
 0x59b   :  { %3143 = vmatpush3.msra.mxu1 %v3894_v27 }
 0x59c   :  { %3144 = vmatprep.subr.mxu1 %v3673_v0 }
 0x59d   :  { %3145 = vmatpush3.msra.mxu1 %v3900_v36 }
 0x59e   :  { %3146 = vmatprep.subr.mxu1 %v3673_v0 }
 0x59f   :  { %3147 = vmatpush3.msra.mxu1 %v3906_v38 }
 0x5a0   :  { %3148 = vmatprep.subr.mxu1 %v3673_v0 }
 0x5a1   :  { %3149 = vmatpush3.msra.mxu1 %v3912_v42 }
 0x5a2   :  { %3150 = vmatprep.subr.mxu1 %v3673_v0 }
 0x5a3   :  { %3151 = vmatpush3.msra.mxu1 %v3921_v45 }
 0x5a4   :  { %3166 = vmatprep.subr.mxu1 %v3673_v0 }
 0x63c   :  { %v509_v1 = vpop.f32.mrf.mxu1 }
 0x63d   :  { %v510_v3 = vadd.f32 %v3994_v63, %v509_v1 }
 0x63e   :  { %v3056_v4 = vpop.f32.mrf.mxu1 }
 0x63f   :  { %3435 = vtanh.f32 %v510_v3  ;;  %v2757_v20 = vmul.f32 -1.442695, %v510_v3 }
 0x64c   :  { %v3436_v8 = vpop.eup %3435  ;;  %v715_v9 = vpop.f32.mrf.mxu1 }
 0x64d   :  { %v716_v11 = vadd.f32 %v3853_v55, %v715_v9  ;;  %526 = vrot.lane.b32.xlu1 %v3436_v8, %s3675_s29 }
 0x64e   :  { %v3086_v12 = vpop.f32.mrf.mxu1 }
 0x64f   :  { %3437 = vtanh.f32 %v716_v11  ;;  %v2761_v21 = vmul.f32 -1.442695, %v716_v11 }
 0x654   :  { %v917_v14 = vpop.f32.mrf.mxu1 }
 0x655   :  { %v921_v15 = vadd.f32 %v917_v14, %v168_v13 }
 0x656   :  { %v3116_v16 = vpop.f32.mrf.mxu1 }
 0x657   :  { %3439 = vtanh.f32 %v921_v15  ;;  %v2765_v24 = vmul.f32 -1.442695, %v921_v15 }
 0x658   :  { %3441 = vpow2.f32 %v2757_v20 }
 0x659   :  { %3443 = vpow2.f32 %v2761_v21 }
 0x65c   :  { %v3438_v17 = vpop.eup %3437 }
 0x65d   :  { %728 = vrot.lane.b32.xlu0 %v3438_v17, %s3675_s29 }
 0x661   :  { %521 = vrot.lane.b32.xlu0 %v2751_v18, %s3675_s29 }
 0x664   :  { %v3440_v19 = vpop.eup %3439 }
 0x665   :  { %931 = vrot.lane.b32.xlu1 %v3440_v19, %s3675_s29  ;;  %v3442_v50 = vpop.eup %3441 }
 0x666   :  { %v516_v22 = vadd.f32 1.0, %v3442_v50  ;;  %v3444_v25 = vpop.eup %3443 }
 0x667   :  { %v722_v32 = vadd.f32 1.0, %v3444_v25 }
 0x668   :  { %3445 = vrcp.f32 %v516_v22 }
 0x669   :  { %3447 = vpow2.f32 %v2765_v24 }
 0x66a   :  { %3449 = vrcp.f32 %v722_v32 }
 0x675   :  { %v3446_v40 = vpop.eup %3445 }
 0x676   :  { %v3448_v47 = vpop.eup %3447 }
 0x677   :  { %v925_v48 = vadd.f32 1.0, %v3448_v47  ;;  %v3450_v56 = vpop.eup %3449 }
 0x678   :  { %v726_v8 = vmul.f32 %v3450_v56, %v3873_v23 }
 0x679   :  { %3451 = vrcp.f32 %v925_v48 }
 0x686   :  { %v3452_v59 = vpop.eup %3451 }
 0x687   :  { %v929_v13 = vmul.f32 %v3452_v59, %v3878_v26 }
 0x6bf   :  { %v527_v44 = vpop.permute.xlu1 %526 }
 0x6c0   :  { %v529_v46 = vmul.f32 %v3446_v40, %v527_v44 }
 0x6c2   :  { %531 = vrot.lane.b32.xlu1 %v529_v46, %s3675_s29 }
 0x6cf   :  { %v729_v57 = vpop.permute.xlu0 %728 }
 0x6d0   :  { %v731_v58 = vmul.f32 %v3450_v56, %v729_v57 }
 0x6d2   :  { %733 = vrot.lane.b32.xlu0 %v731_v58, %s3675_s29 }
 0x6d3   :  { %v522_v62 = vpop.permute.xlu0 %521 }
 0x6d4   :  { %v524_v1 = vmul.f32 %v3446_v40, %v522_v62 }
 0x6d7   :  { %v932_v60 = vpop.permute.xlu1 %931 }
 0x6d8   :  { %v934_v61 = vmul.f32 %v3452_v59, %v932_v60 }
 0x6da   :  { %936 = vrot.lane.b32.xlu1 %v934_v61, %s3675_s29 }
 0x734   :  { %v532_v3 = vpop.permute.xlu1 %531 }
 0x735   :  { %v4010_v4 = vadd.f32 %v532_v3, %v524_v1 }
 0x737   :  { %3453 = vtanh.f32 %v4010_v4 }
 0x744   :  { %v3454_v9 = vpop.eup %3453  ;;  %v734_v11 = vpop.permute.xlu0 %733 }
 0x745   :  { %v4014_v12 = vadd.f32 %v734_v11, %v726_v8  ;;  %537 = vrot.lane.b32.xlu0 %v3454_v9, %s3675_s29 }
 0x747   :  { %3455 = vtanh.f32 %v4014_v12 }
 0x74c   :  { %v937_v14 = vpop.permute.xlu1 %936 }
 0x74d   :  { %v4019_v15 = vadd.f32 %v937_v14, %v929_v13 }
 0x74f   :  { %3457 = vtanh.f32 %v4019_v15 }
 0x754   :  { %v3456_v16 = vpop.eup %3455 }
 0x755   :  { %739 = vrot.lane.b32.xlu1 %v3456_v16, %s3675_s29 }
 0x75c   :  { %v3458_v17 = vpop.eup %3457 }
 0x75d   :  { %942 = vrot.lane.b32.xlu0 %v3458_v17, %s3675_s29 }
 0x7b7   :  { %v538_v23 = vpop.permute.xlu0 %537 }
 0x7b8   :  { %v540_v18 = vmul.f32 %v3446_v40, %v538_v23 }
 0x7ba   :  { %748 = vrot.lane.b32.xlu0 %v540_v18, %s3677_s25 }
 0x7c7   :  { %v740_v19 = vpop.permute.xlu1 %739 }
 0x7c8   :  { %v742_v20 = vmul.f32 %v3450_v56, %v740_v19 }
 0x7ca   :  { %744 = vrot.lane.b32.xlu1 %v742_v20, %s3676_s0  ;;  %950 = vrot.lane.b32.xlu0 %v742_v20, %s3677_s25 }
 0x7cf   :  { %v943_v26 = vpop.permute.xlu0 %942 }
 0x7d0   :  { %v945_v21 = vmul.f32 %v3452_v59, %v943_v26  ;;  %v173_v59 = vadd.f32 %v3838_v49, %v3747_v10 }
 0x7d2   :  { %947 = vrot.lane.b32.xlu1 %v945_v21, %s3676_s0 }
 0x82c   :  { %v749_v50 = vpop.permute.xlu0 %748 }
 0x83c   :  { %v745_v22 = vpop.permute.xlu1 %744  ;;  %v951_v32 = vpop.permute.xlu0 %950 }
 0x83d   :  { %v751_v24 = vsel %vm217_vm2, %v745_v22, %v749_v50 }
 0x83e   :  { %3104 = vmatmul.mubr.msk.f32.vlgmr.msra.gmra.mxu0 %vm329_vm3, %v751_v24 }
 0x83f   :  { %3118 = vmatpush3.msra.mxu0 %v3759_v28  ;;  %3133 = vmatprep.mubr.msk.f32.mxu0 %vm3674_vm0, %v3673_v0 }
 0x840   :  { %3119 = vmatprep.subr.mxu0 %v3673_v0 }
 0x841   :  { %3120 = vmatpush3.msra.mxu0 %v3769_v31 }
 0x842   :  { %3121 = vmatprep.subr.mxu0 %v3673_v0 }
 0x843   :  { %3122 = vmatpush3.msra.mxu0 %v3776_v33 }
 0x844   :  { %3123 = vmatprep.subr.mxu0 %v3673_v0  ;;  %v948_v25 = vpop.permute.xlu1 %947 }
 0x845   :  { %3124 = vmatpush3.msra.mxu0 %v3784_v35  ;;  %v953_v40 = vsel %vm217_vm2, %v948_v25, %v951_v32 }
 0x846   :  { %3125 = vmatprep.subr.mxu0 %v3673_v0 }
 0x847   :  { %3126 = vmatpush3.msra.mxu0 %v3792_v37 }
 0x848   :  { %3127 = vmatprep.subr.mxu0 %v3673_v0 }
 0x849   :  { %3128 = vmatpush3.msra.mxu0 %v3800_v39 }
 0x84a   :  { %3129 = vmatprep.subr.mxu0 %v3673_v0 }
 0x84b   :  { %3130 = vmatpush3.msra.mxu0 %v3805_v41 }
 0x84c   :  { %3131 = vmatprep.subr.mxu0 %v3673_v0 }
 0x84d   :  { %3132 = vmatpush3.msra.mxu0 %v3813_v43 }
 0x84e   :  { %3134 = vmatmul.mubr.msk.f32.vlgmr.msra.gmra.mxu0 %vm329_vm3, %v953_v40  ;;  %3155 = vmatprep.subr.mxu0 %v3673_v0 }
 0x84f   :  { %3156 = vmatpush3.msra.mxu0 %v3711_v2  ;;  %3163 = vmatprep.mubr.msk.f32.mxu0 %vm3674_vm0, %v3673_v0 }
 0x850   :  { %3157 = vmatprep.subr.mxu0 %v3673_v0 }
 0x851   :  { %3158 = vmatpush3.msra.mxu0 %v3720_v5 }
 0x852   :  { %3159 = vmatprep.subr.mxu0 %v3673_v0 }
 0x853   :  { %3160 = vmatpush3.msra.mxu0 %v3725_v6 }
 0x854   :  { %3161 = vmatprep.subr.mxu0 %v3673_v0 }
 0x855   :  { %3162 = vmatpush3.msra.mxu0 %v3730_v7 }
 0x856   :  { %3164 = vmatmul.mubr.msk.f32.vlgmr.msra.gmra.mxu0 %vm217_vm2, %v948_v25  ;;  %3185 = vmatprep.subr.mxu0 %v3673_v0 }
 0x857   :  { %3186 = vmatpush3.msra.mxu0 %v3881_v29  ;;  %3201 = vmatprep.mubr.msk.f32.mxu0 %vm3674_vm0, %v3673_v0 }
 0x858   :  { %3187 = vmatprep.subr.mxu0 %v3673_v0 }
 0x859   :  { %3188 = vmatpush3.msra.mxu0 %v3883_v30 }
 0x85a   :  { %3189 = vmatprep.subr.mxu0 %v3673_v0 }
 0x85b   :  { %3190 = vmatpush3.msra.mxu0 %v3888_v34 }
 0x85c   :  { %3191 = vmatprep.subr.mxu0 %v3673_v0 }
 0x85d   :  { %3192 = vmatpush3.msra.mxu0 %v3894_v27 }
 0x85e   :  { %3193 = vmatprep.subr.mxu0 %v3673_v0 }
 0x85f   :  { %3194 = vmatpush3.msra.mxu0 %v3900_v36 }
 0x860   :  { %3195 = vmatprep.subr.mxu0 %v3673_v0 }
 0x861   :  { %3196 = vmatpush3.msra.mxu0 %v3906_v38 }
 0x862   :  { %3197 = vmatprep.subr.mxu0 %v3673_v0 }
 0x863   :  { %3198 = vmatpush3.msra.mxu0 %v3912_v42 }
 0x864   :  { %3199 = vmatprep.subr.mxu0 %v3673_v0 }
 0x865   :  { %3200 = vmatpush3.msra.mxu0 %v3921_v45 }
 0x866   :  { %3215 = vmatprep.subr.mxu0 %v3673_v0 }
 0x8fe   :  { %v821_v44 = vpop.f32.mrf.mxu0 }
 0x8ff   :  { %v822_v46 = vadd.f32 %v3994_v63, %v821_v44 }
 0x900   :  { %v3105_v47 = vpop.f32.mrf.mxu0 }
 0x901   :  { %3459 = vtanh.f32 %v822_v46  ;;  %v2763_v8 = vmul.f32 -1.442695, %v822_v46 }
 0x90e   :  { %v3460_v48 = vpop.eup %3459  ;;  %v1023_v56 = vpop.f32.mrf.mxu0 }
 0x90f   :  { %v1024_v57 = vadd.f32 %v3853_v55, %v1023_v56  ;;  %834 = vrot.lane.b32.xlu1 %v3460_v48, %s3675_s29 }
 0x910   :  { %v3135_v58 = vpop.f32.mrf.mxu0 }
 0x911   :  { %3461 = vtanh.f32 %v1024_v57  ;;  %v2767_v9 = vmul.f32 -1.442695, %v1024_v57 }
 0x916   :  { %v1225_v60 = vpop.f32.mrf.mxu0 }
 0x917   :  { %v1229_v61 = vadd.f32 %v1225_v60, %v173_v59 }
 0x918   :  { %v3165_v62 = vpop.f32.mrf.mxu0 }
 0x919   :  { %3463 = vtanh.f32 %v1229_v61  ;;  %v2771_v14 = vmul.f32 -1.442695, %v1229_v61 }
 0x91a   :  { %3465 = vpow2.f32 %v2763_v8 }
 0x91b   :  { %3467 = vpow2.f32 %v2767_v9 }
 0x91e   :  { %v3462_v1 = vpop.eup %3461 }
 0x91f   :  { %1036 = vrot.lane.b32.xlu0 %v3462_v1, %s3675_s29 }
 0x926   :  { %v3464_v3 = vpop.eup %3463 }
 0x927   :  { %1239 = vrot.lane.b32.xlu1 %v3464_v3, %s3675_s29  ;;  %v3466_v11 = vpop.eup %3465 }
 0x928   :  { %v828_v13 = vadd.f32 1.0, %v3466_v11  ;;  %v3468_v49 = vpop.eup %3467 }
 0x929   :  { %v1030_v16 = vadd.f32 1.0, %v3468_v49 }
 0x92a   :  { %3469 = vrcp.f32 %v828_v13 }
 0x92b   :  { %3471 = vpow2.f32 %v2771_v14 }
 0x92c   :  { %3473 = vrcp.f32 %v1030_v16 }
 0x937   :  { %v3470_v17 = vpop.eup %3469 }
 0x938   :  { %v3472_v19 = vpop.eup %3471  ;;  %v832_v32 = vmul.f32 %v3470_v17, %v4010_v4 }
 0x939   :  { %v1233_v20 = vadd.f32 1.0, %v3472_v19  ;;  %v3474_v26 = vpop.eup %3473 }
 0x93a   :  { %v1034_v46 = vmul.f32 %v3474_v26, %v4014_v12 }
 0x93b   :  { %3475 = vrcp.f32 %v1233_v20 }
 0x948   :  { %v3476_v22 = vpop.eup %3475 }
 0x949   :  { %v1237_v57 = vmul.f32 %v3476_v22, %v4019_v15 }
 0x981   :  { %v835_v23 = vpop.permute.xlu1 %834 }
 0x982   :  { %v837_v18 = vmul.f32 %v3470_v17, %v835_v23 }
 0x984   :  { %839 = vrot.lane.b32.xlu0 %v837_v18, %s3675_s29 }
 0x991   :  { %v1037_v21 = vpop.permute.xlu0 %1036 }
 0x992   :  { %v1039_v50 = vmul.f32 %v3474_v26, %v1037_v21 }
 0x994   :  { %1041 = vrot.lane.b32.xlu1 %v1039_v50, %s3675_s29 }
 0x999   :  { %v1240_v24 = vpop.permute.xlu1 %1239 }
 0x99a   :  { %v1242_v25 = vmul.f32 %v3476_v22, %v1240_v24 }
 0x99c   :  { %1244 = vrot.lane.b32.xlu0 %v1242_v25, %s3675_s29 }
 0x9f6   :  { %v840_v40 = vpop.permute.xlu0 %839 }
 0x9f7   :  { %v4090_v44 = vadd.f32 %v840_v40, %v832_v32 }
 0x9f9   :  { %3477 = vtanh.f32 %v4090_v44 }
 0xa06   :  { %v3478_v47 = vpop.eup %3477  ;;  %v1042_v48 = vpop.permute.xlu1 %1041 }
 0xa07   :  { %v4094_v56 = vadd.f32 %v1042_v48, %v1034_v46  ;;  %845 = vrot.lane.b32.xlu1 %v3478_v47, %s3675_s29 }
 0xa09   :  { %3479 = vtanh.f32 %v4094_v56 }
 0xa0e   :  { %v1245_v58 = vpop.permute.xlu0 %1244 }
 0xa0f   :  { %v4099_v59 = vadd.f32 %v1245_v58, %v1237_v57 }
 0xa11   :  { %3481 = vtanh.f32 %v4099_v59 }
 0xa16   :  { %v3480_v4 = vpop.eup %3479 }
 0xa17   :  { %1047 = vrot.lane.b32.xlu0 %v3480_v4, %s3675_s29 }
 0xa1e   :  { %v3482_v60 = vpop.eup %3481 }
 0xa1f   :  { %1250 = vrot.lane.b32.xlu1 %v3482_v60, %s3675_s29 }
 0xa79   :  { %v846_v12 = vpop.permute.xlu1 %845 }
 0xa7a   :  { %v848_v61 = vmul.f32 %v3470_v17, %v846_v12 }
 0xa7c   :  { %1056 = vrot.lane.b32.xlu1 %v848_v61, %s3677_s25 }
 0xa89   :  { %v1048_v62 = vpop.permute.xlu0 %1047 }
 0xa8a   :  { %v1050_v1 = vmul.f32 %v3474_v26, %v1048_v62 }
 0xa8c   :  { %1052 = vrot.lane.b32.xlu0 %v1050_v1, %s3676_s0  ;;  %1258 = vrot.lane.b32.xlu1 %v1050_v1, %s3677_s25 }
 0xa91   :  { %v1251_v15 = vpop.permute.xlu1 %1250 }
 0xa92   :  { %v1253_v3 = vmul.f32 %v3476_v22, %v1251_v15 }
 0xa94   :  { %1255 = vrot.lane.b32.xlu0 %v1253_v3, %s3676_s0 }
 0xaee   :  { %v1057_v8 = vpop.permute.xlu1 %1056 }
 0xafe   :  { %v1053_v9 = vpop.permute.xlu0 %1052 }
 0xaff   :  { %v1059_v11 = vsel %vm217_vm2, %v1053_v9, %v1057_v8 }
 0xb00   :  { %3153 = vmatmul.mubr.msk.f32.vlgmr.msra.gmra.mxu1 %vm329_vm3, %v1059_v11 }
 0xb01   :  { %3167 = vmatpush3.msra.mxu1 %v3759_v28  ;;  %3182 = vmatprep.mubr.msk.f32.mxu1 %vm3674_vm0, %v3673_v0 }
 0xb02   :  { %3168 = vmatprep.subr.mxu1 %v3673_v0 }
 0xb03   :  { %3169 = vmatpush3.msra.mxu1 %v3769_v31  ;;  %v1259_v31 = vpop.permute.xlu1 %1258 }
 0xb04   :  { %3170 = vmatprep.subr.mxu1 %v3673_v0 }
 0xb05   :  { %3171 = vmatpush3.msra.mxu1 %v3776_v33 }
 0xb06   :  { %3172 = vmatprep.subr.mxu1 %v3673_v0  ;;  %v1256_v28 = vpop.permute.xlu0 %1255 }
 0xb07   :  { %3173 = vmatpush3.msra.mxu1 %v3784_v35  ;;  %v1261_v33 = vsel %vm217_vm2, %v1256_v28, %v1259_v31 }
 0xb08   :  { %3174 = vmatprep.subr.mxu1 %v3673_v0 }
 0xb09   :  { %3175 = vmatpush3.msra.mxu1 %v3792_v37 }
 0xb0a   :  { %3176 = vmatprep.subr.mxu1 %v3673_v0 }
 0xb0b   :  { %3177 = vmatpush3.msra.mxu1 %v3800_v39 }
 0xb0c   :  { %3178 = vmatprep.subr.mxu1 %v3673_v0 }
 0xb0d   :  { %3179 = vmatpush3.msra.mxu1 %v3805_v41  ;;  %v178_v41 = vadd.f32 %v3747_v10, %v3844_v52 }
 0xb0e   :  { %3180 = vmatprep.subr.mxu1 %v3673_v0 }
 0xb0f   :  { %3181 = vmatpush3.msra.mxu1 %v3813_v43 }
 0xb10   :  { %3183 = vmatmul.mubr.msk.f32.vlgmr.msra.gmra.mxu1 %vm329_vm3, %v1261_v33  ;;  %3204 = vmatprep.subr.mxu1 %v3673_v0 }
 0xb11   :  { %3205 = vmatpush3.msra.mxu1 %v3711_v2  ;;  %3212 = vmatprep.mubr.msk.f32.mxu1 %vm3674_vm0, %v3673_v0 }
 0xb12   :  { %3206 = vmatprep.subr.mxu1 %v3673_v0 }
 0xb13   :  { %3207 = vmatpush3.msra.mxu1 %v3720_v5 }
 0xb14   :  { %3208 = vmatprep.subr.mxu1 %v3673_v0 }
 0xb15   :  { %3209 = vmatpush3.msra.mxu1 %v3725_v6 }
 0xb16   :  { %3210 = vmatprep.subr.mxu1 %v3673_v0 }
 0xb17   :  { %3211 = vmatpush3.msra.mxu1 %v3730_v7 }
 0xb18   :  { %3213 = vmatmul.mubr.msk.f32.vlgmr.msra.gmra.mxu1 %vm217_vm2, %v1256_v28  ;;  %3234 = vmatprep.subr.mxu1 %v3673_v0 }
 0xb19   :  { %3235 = vmatpush3.msra.mxu1 %v3881_v29  ;;  %3250 = vmatprep.mubr.msk.f32.mxu1 %vm3674_vm0, %v3673_v0 }
 0xb1a   :  { %3236 = vmatprep.subr.mxu1 %v3673_v0 }
 0xb1b   :  { %3237 = vmatpush3.msra.mxu1 %v3883_v30 }
 0xb1c   :  { %3238 = vmatprep.subr.mxu1 %v3673_v0 }
 0xb1d   :  { %3239 = vmatpush3.msra.mxu1 %v3888_v34 }
 0xb1e   :  { %3240 = vmatprep.subr.mxu1 %v3673_v0 }
 0xb1f   :  { %3241 = vmatpush3.msra.mxu1 %v3894_v27 }
 0xb20   :  { %3242 = vmatprep.subr.mxu1 %v3673_v0 }
 0xb21   :  { %3243 = vmatpush3.msra.mxu1 %v3900_v36 }
 0xb22   :  { %3244 = vmatprep.subr.mxu1 %v3673_v0 }
 0xb23   :  { %3245 = vmatpush3.msra.mxu1 %v3906_v38 }
 0xb24   :  { %3246 = vmatprep.subr.mxu1 %v3673_v0 }
 0xb25   :  { %3247 = vmatpush3.msra.mxu1 %v3912_v42 }
 0xb26   :  { %3248 = vmatprep.subr.mxu1 %v3673_v0 }
 0xb27   :  { %3249 = vmatpush3.msra.mxu1 %v3921_v45 }
 0xb28   :  { %3264 = vmatprep.subr.mxu1 %v3673_v0 }
 0xbc0   :  { %v1129_v2 = vpop.f32.mrf.mxu1 }
 0xbc1   :  { %v1130_v5 = vadd.f32 %v3994_v63, %v1129_v2 }
 0xbc2   :  { %v3154_v6 = vpop.f32.mrf.mxu1 }
 0xbc3   :  { %3483 = vtanh.f32 %v1130_v5  ;;  %v2769_v17 = vmul.f32 -1.442695, %v1130_v5  ;;  %v4190_v5 = vld [vmem:[#allocation2 + $0x60] sm:$0xff]  ;;  %v4196_v6 = vld [vmem:[#allocation2 + $0x58] sm:$0xff] }
 0xbd0   :  { %v3484_v7 = vpop.eup %3483  ;;  %v1331_v35 = vpop.f32.mrf.mxu1 }
 0xbd1   :  { %v1332_v37 = vadd.f32 %v3853_v55, %v1331_v35  ;;  %1142 = vrot.lane.b32.xlu0 %v3484_v7, %s3675_s29  ;;  %v4200_v7 = vld [vmem:[#allocation2 + $0x50] sm:$0xff]  ;;  %v4204_v35 = vld [vmem:[#allocation2 + $0x48] sm:$0xff] }
 0xbd2   :  { %v3184_v39 = vpop.f32.mrf.mxu1 }
 0xbd3   :  { %3485 = vtanh.f32 %v1332_v37  ;;  %v2773_v55 = vmul.f32 -1.442695, %v1332_v37  ;;  %v4208_v37 = vld [vmem:[#allocation2 + $0x40] sm:$0xff]  ;;  %v4212_v39 = vld [vmem:[#allocation2 + $0x38] sm:$0xff] }
 0xbd8   :  { %v1533_v43 = vpop.f32.mrf.mxu1 }
 0xbd9   :  { %v1537_v13 = vadd.f32 %v1533_v43, %v178_v41  ;;  %v4216_v43 = vld [vmem:[#allocation2 + $0x30] sm:$0xff] }
 0xbda   :  { %v3214_v14 = vpop.f32.mrf.mxu1 }
 0xbdb   :  { %3487 = vtanh.f32 %v1537_v13  ;;  %v2777_v19 = vmul.f32 -1.442695, %v1537_v13 }
 0xbdc   :  { %3489 = vpow2.f32 %v2769_v17  ;;  %v4232_v17 = vld [vmem:[#allocation2 + $0x18] sm:$0xff] }
 0xbdd   :  { %3491 = vpow2.f32 %v2773_v55  ;;  %v4236_v55 = vld [vmem:[#allocation2 + $0x10] sm:$0xff] }
 0xbe0   :  { %v3486_v49 = vpop.eup %3485 }
 0xbe1   :  { %1344 = vrot.lane.b32.xlu1 %v3486_v49, %s3675_s29  ;;  %v4221_v49 = vld [vmem:[#allocation2 + $0x28] sm:$0xff] }
 0xbe8   :  { %v3488_v16 = vpop.eup %3487 }
 0xbe9   :  { %1547 = vrot.lane.b32.xlu0 %v3488_v16, %s3675_s29  ;;  %v3490_v23 = vpop.eup %3489  ;;  %v4226_v16 = vld [vmem:[#allocation2 + $0x20] sm:$0xff] }
 0xbea   :  { %v1136_v18 = vadd.f32 1.0, %v3490_v23  ;;  %v3492_v10 = vpop.eup %3491  ;;  %v4240_v23 = vld [vmem:[#allocation2 + $0x8] sm:$0xff] }
 0xbeb   :  { %v1338_v52 = vadd.f32 1.0, %v3492_v10 }
 0xbec   :  { %3493 = vrcp.f32 %v1136_v18 }
 0xbed   :  { %3495 = vpow2.f32 %v2777_v19 }
 0xbee   :  { %3497 = vrcp.f32 %v1338_v52 }
 0xbf9   :  { %v3494_v20 = vpop.eup %3493 }
 0xbfa   :  { %v3496_v50 = vpop.eup %3495  ;;  %v1140_v48 = vmul.f32 %v3494_v20, %v4090_v44 }
 0xbfb   :  { %v1541_v22 = vadd.f32 1.0, %v3496_v50  ;;  %v3498_v24 = vpop.eup %3497 }
 0xbfc   :  { %v1342_v4 = vmul.f32 %v3498_v24, %v4094_v56 }
 0xbfd   :  { %3499 = vrcp.f32 %v1541_v22 }
 0xc0a   :  { %v3500_v40 = vpop.eup %3499 }
 0xc0b   :  { %v1545_v62 = vmul.f32 %v3500_v40, %v4099_v59 }
 0xc43   :  { %v1143_v26 = vpop.permute.xlu0 %1142 }
 0xc44   :  { %v1145_v21 = vmul.f32 %v3494_v20, %v1143_v26 }
 0xc46   :  { %1147 = vrot.lane.b32.xlu1 %v1145_v21, %s3675_s29 }
 0xc53   :  { %v1345_v25 = vpop.permute.xlu1 %1344 }
 0xc54   :  { %v1347_v32 = vmul.f32 %v3498_v24, %v1345_v25 }
 0xc56   :  { %1349 = vrot.lane.b32.xlu0 %v1347_v32, %s3675_s29 }
 0xc5b   :  { %v1548_v46 = vpop.permute.xlu0 %1547 }
 0xc5c   :  { %v1550_v47 = vmul.f32 %v3500_v40, %v1548_v46 }
 0xc5e   :  { %1552 = vrot.lane.b32.xlu1 %v1550_v47, %s3675_s29 }
 0xcb8   :  { %v1148_v57 = vpop.permute.xlu1 %1147 }
 0xcb9   :  { %v4170_v58 = vadd.f32 %v1148_v57, %v1140_v48 }
 0xcbb   :  { %3501 = vtanh.f32 %v4170_v58 }
 0xcc8   :  { %v3502_v60 = vpop.eup %3501  ;;  %v1350_v12 = vpop.permute.xlu0 %1349 }
 0xcc9   :  { %v4174_v61 = vadd.f32 %v1350_v12, %v1342_v4  ;;  %1153 = vrot.lane.b32.xlu0 %v3502_v60, %s3675_s29 }
 0xccb   :  { %3503 = vtanh.f32 %v4174_v61 }
 0xcd0   :  { %v1553_v1 = vpop.permute.xlu1 %1552 }
 0xcd1   :  { %v4179_v15 = vadd.f32 %v1553_v1, %v1545_v62 }
 0xcd3   :  { %3505 = vtanh.f32 %v4179_v15 }
 0xcd8   :  { %v3504_v44 = vpop.eup %3503 }
 0xcd9   :  { %1355 = vrot.lane.b32.xlu1 %v3504_v44, %s3675_s29 }
 0xce0   :  { %v3506_v3 = vpop.eup %3505 }
 0xce1   :  { %1558 = vrot.lane.b32.xlu0 %v3506_v3, %s3675_s29 }
 0xd3b   :  { %v1154_v56 = vpop.permute.xlu0 %1153 }
 0xd3c   :  { %v1156_v8 = vmul.f32 %v3494_v20, %v1154_v56 }
 0xd3e   :  { %1364 = vrot.lane.b32.xlu0 %v1156_v8, %s3677_s25 }
 0xd4b   :  { %v1356_v9 = vpop.permute.xlu1 %1355 }
 0xd4c   :  { %v1358_v11 = vmul.f32 %v3498_v24, %v1356_v9 }
 0xd4e   :  { %1360 = vrot.lane.b32.xlu1 %v1358_v11, %s3676_s0  ;;  %1566 = vrot.lane.b32.xlu0 %v1358_v11, %s3677_s25 }
 0xd53   :  { %v1559_v59 = vpop.permute.xlu0 %1558 }
 0xd54   :  { %v1561_v28 = vmul.f32 %v3500_v40, %v1559_v59 }
 0xd56   :  { %1563 = vrot.lane.b32.xlu1 %v1561_v28, %s3676_s0 }
 0xdb0   :  { %v1365_v31 = vpop.permute.xlu0 %1364 }
 0xdc0   :  { %v1361_v33 = vpop.permute.xlu1 %1360  ;;  %v1567_v13 = vpop.permute.xlu0 %1566 }
 0xdc1   :  { %v1367_v2 = vsel %vm217_vm2, %v1361_v33, %v1365_v31 }
 0xdc2   :  { %3202 = vmatmul.mubr.msk.f32.vlgmr.msra.gmra.mxu0 %vm329_vm3, %v1367_v2 }
 0xdc3   :  { %3216 = vmatpush3.msra.mxu0 %v4190_v5  ;;  %3231 = vmatprep.mubr.msk.f32.mxu0 %vm3674_vm0, %v3673_v0 }
 0xdc4   :  { %3217 = vmatprep.subr.mxu0 %v3673_v0 }
 0xdc5   :  { %3218 = vmatpush3.msra.mxu0 %v4196_v6 }
 0xdc6   :  { %3219 = vmatprep.subr.mxu0 %v3673_v0 }
 0xdc7   :  { %3220 = vmatpush3.msra.mxu0 %v4200_v7 }
 0xdc8   :  { %3221 = vmatprep.subr.mxu0 %v3673_v0  ;;  %v1564_v41 = vpop.permute.xlu1 %1563 }
 0xdc9   :  { %3222 = vmatpush3.msra.mxu0 %v4204_v35  ;;  %v1569_v14 = vsel %vm217_vm2, %v1564_v41, %v1567_v13 }
 0xdca   :  { %3223 = vmatprep.subr.mxu0 %v3673_v0 }
 0xdcb   :  { %3224 = vmatpush3.msra.mxu0 %v4208_v37 }
 0xdcc   :  { %3225 = vmatprep.subr.mxu0 %v3673_v0 }
 0xdcd   :  { %3226 = vmatpush3.msra.mxu0 %v4212_v39 }
 0xdce   :  { %3227 = vmatprep.subr.mxu0 %v3673_v0 }
 0xdcf   :  { %3228 = vmatpush3.msra.mxu0 %v4216_v43 }
 0xdd0   :  { %3229 = vmatprep.subr.mxu0 %v3673_v0 }
 0xdd1   :  { %3230 = vmatpush3.msra.mxu0 %v4221_v49 }
 0xdd2   :  { %3232 = vmatmul.mubr.msk.f32.vlgmr.msra.gmra.mxu0 %vm329_vm3, %v1569_v14  ;;  %3253 = vmatprep.subr.mxu0 %v3673_v0 }
 0xdd3   :  { %3254 = vmatpush3.msra.mxu0 %v4226_v16  ;;  %3261 = vmatprep.mubr.msk.f32.mxu0 %vm3674_vm0, %v3673_v0 }
 0xdd4   :  { %3255 = vmatprep.subr.mxu0 %v3673_v0 }
 0xdd5   :  { %3256 = vmatpush3.msra.mxu0 %v4232_v17 }
 0xdd6   :  { %3257 = vmatprep.subr.mxu0 %v3673_v0 }
 0xdd7   :  { %3258 = vmatpush3.msra.mxu0 %v4236_v55 }
 0xdd8   :  { %3259 = vmatprep.subr.mxu0 %v3673_v0 }
 0xdd9   :  { %3260 = vmatpush3.msra.mxu0 %v4240_v23 }
 0xdda   :  { %3262 = vmatmul.mubr.msk.f32.vlgmr.msra.gmra.mxu0 %vm217_vm2, %v1564_v41  ;;  %3283 = vmatprep.subr.mxu0 %v3673_v0 }
 0xddb   :  { %3284 = vmatpush3.msra.mxu0 %v3881_v29  ;;  %3299 = vmatprep.mubr.msk.f32.mxu0 %vm3674_vm0, %v3673_v0 }
 0xddc   :  { %3285 = vmatprep.subr.mxu0 %v3673_v0 }
 0xddd   :  { %3286 = vmatpush3.msra.mxu0 %v3883_v30 }
 0xdde   :  { %3287 = vmatprep.subr.mxu0 %v3673_v0 }
 0xddf   :  { %3288 = vmatpush3.msra.mxu0 %v3888_v34 }
 0xde0   :  { %3289 = vmatprep.subr.mxu0 %v3673_v0 }
 0xde1   :  { %3290 = vmatpush3.msra.mxu0 %v3894_v27 }
 0xde2   :  { %3291 = vmatprep.subr.mxu0 %v3673_v0 }
 0xde3   :  { %3292 = vmatpush3.msra.mxu0 %v3900_v36 }
 0xde4   :  { %3293 = vmatprep.subr.mxu0 %v3673_v0 }
 0xde5   :  { %3294 = vmatpush3.msra.mxu0 %v3906_v38  ;;  %v4267_v38 = vld [vmem:[%s4530_s3 + $0x1] ss:$0 sm:$0xff] }
 0xde6   :  { %3295 = vmatprep.subr.mxu0 %v3673_v0 }
 0xde7   :  { %3296 = vmatpush3.msra.mxu0 %v3912_v42 }
 0xde8   :  { %3297 = vmatprep.subr.mxu0 %v3673_v0 }
 0xde9   :  { %3298 = vmatpush3.msra.mxu0 %v3921_v45  ;;  %v4274_v45 = vld [vmem:[%s4530_s3] ss:$0 sm:$0xff] }
 0xdea   :  { %3313 = vmatprep.subr.mxu0 %v3673_v0  ;;  %v183_v19 = vadd.f32 %v4274_v45, %v3842_v51 }
 0xe82   :  { %v1437_v29 = vpop.f32.mrf.mxu0 }
 0xe83   :  { %v1438_v30 = vadd.f32 %v3994_v63, %v1437_v29 }
 0xe84   :  { %v3203_v34 = vpop.f32.mrf.mxu0 }
 0xe85   :  { %3507 = vtanh.f32 %v1438_v30  ;;  %v2775_v50 = vmul.f32 -1.442695, %v1438_v30 }
 0xe92   :  { %v3508_v27 = vpop.eup %3507  ;;  %v1639_v36 = vpop.f32.mrf.mxu0 }
 0xe93   :  { %v1640_v42 = vadd.f32 %v4267_v38, %v1639_v36  ;;  %1450 = vrot.lane.b32.xlu1 %v3508_v27, %s3675_s29 }
 0xe94   :  { %v3233_v18 = vpop.f32.mrf.mxu0 }
 0xe95   :  { %3509 = vtanh.f32 %v1640_v42  ;;  %v2779_v22 = vmul.f32 -1.442695, %v1640_v42 }
 0xe9a   :  { %v1841_v10 = vpop.f32.mrf.mxu0 }
 0xe9b   :  { %v1845_v52 = vadd.f32 %v1841_v10, %v183_v19 }
 0xe9c   :  { %v3263_v20 = vpop.f32.mrf.mxu0 }
 0xe9d   :  { %3511 = vtanh.f32 %v1845_v52  ;;  %v2783_v32 = vmul.f32 -1.442695, %v1845_v52  ;;  %v4335_v52 = vld [vmem:[#allocation2 + $0xa0] sm:$0xff]  ;;  %v4341_v20 = vld [vmem:[#allocation2 + $0x98] sm:$0xff] }
 0xe9e   :  { %3513 = vpow2.f32 %v2775_v50  ;;  %v4353_v50 = vld [vmem:[#allocation2 + $0x80] sm:$0xff] }
 0xe9f   :  { %3515 = vpow2.f32 %v2779_v22  ;;  %v4357_v22 = vld [vmem:[#allocation2 + $0x78] sm:$0xff] }
 0xea2   :  { %v3510_v26 = vpop.eup %3509 }
 0xea3   :  { %1652 = vrot.lane.b32.xlu0 %v3510_v26, %s3675_s29  ;;  %v4345_v26 = vld [vmem:[#allocation2 + $0x90] sm:$0xff] }
 0xeaa   :  { %v3512_v21 = vpop.eup %3511 }
 0xeab   :  { %1855 = vrot.lane.b32.xlu1 %v3512_v21, %s3675_s29  ;;  %v3514_v24 = vpop.eup %3513  ;;  %v4349_v21 = vld [vmem:[#allocation2 + $0x88] sm:$0xff] }
 0xeac   :  { %v1444_v25 = vadd.f32 1.0, %v3514_v24  ;;  %v3516_v51 = vpop.eup %3515  ;;  %v4361_v24 = vld [vmem:[#allocation2 + $0x70] sm:$0xff] }
 0xead   :  { %v1646_v40 = vadd.f32 1.0, %v3516_v51 }
 0xeae   :  { %3517 = vrcp.f32 %v1444_v25  ;;  %v4365_v25 = vld [vmem:[#allocation2 + $0x68] sm:$0xff] }
 0xeaf   :  { %3519 = vpow2.f32 %v2783_v32 }
 0xeb0   :  { %3521 = vrcp.f32 %v1646_v40 }
 0xebb   :  { %v3518_v46 = vpop.eup %3517 }
 0xebc   :  { %v3520_v57 = vpop.eup %3519  ;;  %v1448_v56 = vmul.f32 %v3518_v46, %v4170_v58 }
 0xebd   :  { %v1849_v4 = vadd.f32 1.0, %v3520_v57  ;;  %v3522_v60 = vpop.eup %3521 }
 0xebe   :  { %v1650_v11 = vmul.f32 %v3522_v60, %v4174_v61 }
 0xebf   :  { %3523 = vrcp.f32 %v1849_v4  ;;  %v188_v4 = vadd.f32 %v4274_v45, %v3848_v54 }
 0xecc   :  { %v3524_v1 = vpop.eup %3523 }
 0xecd   :  { %v1853_v33 = vmul.f32 %v3524_v1, %v4179_v15 }
 0xf05   :  { %v1451_v47 = vpop.permute.xlu1 %1450 }
 0xf06   :  { %v1453_v48 = vmul.f32 %v3518_v46, %v1451_v47 }
 0xf08   :  { %1455 = vrot.lane.b32.xlu0 %v1453_v48, %s3675_s29 }
 0xf15   :  { %v1653_v12 = vpop.permute.xlu0 %1652 }
 0xf16   :  { %v1655_v62 = vmul.f32 %v3522_v60, %v1653_v12 }
 0xf18   :  { %1657 = vrot.lane.b32.xlu1 %v1655_v62, %s3675_s29 }
 0xf1d   :  { %v1856_v44 = vpop.permute.xlu1 %1855 }
 0xf1e   :  { %v1858_v3 = vmul.f32 %v3524_v1, %v1856_v44 }
 0xf20   :  { %1860 = vrot.lane.b32.xlu0 %v1858_v3, %s3675_s29 }
 0xf7a   :  { %v1456_v8 = vpop.permute.xlu0 %1455 }
 0xf7b   :  { %v4284_v9 = vadd.f32 %v1456_v8, %v1448_v56 }
 0xf7d   :  { %3525 = vtanh.f32 %v4284_v9 }
 0xf8a   :  { %v3526_v59 = vpop.eup %3525  ;;  %v1658_v28 = vpop.permute.xlu1 %1657 }
 0xf8b   :  { %v4288_v31 = vadd.f32 %v1658_v28, %v1650_v11  ;;  %1461 = vrot.lane.b32.xlu1 %v3526_v59, %s3675_s29 }
 0xf8d   :  { %3527 = vtanh.f32 %v4288_v31 }
 0xf92   :  { %v1861_v2 = vpop.permute.xlu0 %1860 }
 0xf93   :  { %v4293_v41 = vadd.f32 %v1861_v2, %v1853_v33 }
 0xf95   :  { %3529 = vtanh.f32 %v4293_v41 }
 0xf9a   :  { %v3528_v58 = vpop.eup %3527 }
 0xf9b   :  { %1663 = vrot.lane.b32.xlu0 %v3528_v58, %s3675_s29 }
 0xfa2   :  { %v3530_v13 = vpop.eup %3529 }
 0xfa3   :  { %1866 = vrot.lane.b32.xlu1 %v3530_v13, %s3675_s29 }
 0xffd   :  { %v1462_v61 = vpop.permute.xlu1 %1461 }
 0xffe   :  { %v1464_v14 = vmul.f32 %v3518_v46, %v1462_v61 }
0x1000   :  { %1672 = vrot.lane.b32.xlu1 %v1464_v14, %s3677_s25 }
0x100d   :  { %v1664_v29 = vpop.permute.xlu0 %1663 }
0x100e   :  { %v1666_v30 = vmul.f32 %v3522_v60, %v1664_v29 }
0x1010   :  { %1668 = vrot.lane.b32.xlu0 %v1666_v30, %s3676_s0  ;;  %1874 = vrot.lane.b32.xlu1 %v1666_v30, %s3677_s25 }
0x1015   :  { %v1867_v15 = vpop.permute.xlu1 %1866 }
0x1016   :  { %v1869_v34 = vmul.f32 %v3524_v1, %v1867_v15 }
0x1018   :  { %1871 = vrot.lane.b32.xlu0 %v1869_v34, %s3676_s0 }
0x1072   :  { %v1673_v27 = vpop.permute.xlu1 %1672 }
0x1082   :  { %v1669_v36 = vpop.permute.xlu0 %1668  ;;  %v1875_v19 = vpop.permute.xlu1 %1874 }
0x1083   :  { %v1675_v42 = vsel %vm217_vm2, %v1669_v36, %v1673_v27 }
0x1084   :  { %3251 = vmatmul.mubr.msk.f32.vlgmr.msra.gmra.mxu1 %vm329_vm3, %v1675_v42 }
0x1085   :  { %3265 = vmatpush3.msra.mxu1 %v4190_v5  ;;  %3280 = vmatprep.mubr.msk.f32.mxu1 %vm3674_vm0, %v3673_v0 }
0x1086   :  { %3266 = vmatprep.subr.mxu1 %v3673_v0 }
0x1087   :  { %3267 = vmatpush3.msra.mxu1 %v4196_v6 }
0x1088   :  { %3268 = vmatprep.subr.mxu1 %v3673_v0 }
0x1089   :  { %3269 = vmatpush3.msra.mxu1 %v4200_v7 }
0x108a   :  { %3270 = vmatprep.subr.mxu1 %v3673_v0  ;;  %v1872_v18 = vpop.permute.xlu0 %1871 }
0x108b   :  { %3271 = vmatpush3.msra.mxu1 %v4204_v35  ;;  %v1877_v10 = vsel %vm217_vm2, %v1872_v18, %v1875_v19 }
0x108c   :  { %3272 = vmatprep.subr.mxu1 %v3673_v0 }
0x108d   :  { %3273 = vmatpush3.msra.mxu1 %v4208_v37 }
0x108e   :  { %3274 = vmatprep.subr.mxu1 %v3673_v0 }
0x108f   :  { %3275 = vmatpush3.msra.mxu1 %v4212_v39 }
0x1090   :  { %3276 = vmatprep.subr.mxu1 %v3673_v0 }
0x1091   :  { %3277 = vmatpush3.msra.mxu1 %v4216_v43 }
0x1092   :  { %3278 = vmatprep.subr.mxu1 %v3673_v0 }
0x1093   :  { %3279 = vmatpush3.msra.mxu1 %v4221_v49 }
0x1094   :  { %3281 = vmatmul.mubr.msk.f32.vlgmr.msra.gmra.mxu1 %vm329_vm3, %v1877_v10  ;;  %3302 = vmatprep.subr.mxu1 %v3673_v0 }
0x1095   :  { %3303 = vmatpush3.msra.mxu1 %v4226_v16  ;;  %3310 = vmatprep.mubr.msk.f32.mxu1 %vm3674_vm0, %v3673_v0 }
0x1096   :  { %3304 = vmatprep.subr.mxu1 %v3673_v0 }
0x1097   :  { %3305 = vmatpush3.msra.mxu1 %v4232_v17 }
0x1098   :  { %3306 = vmatprep.subr.mxu1 %v3673_v0 }
0x1099   :  { %3307 = vmatpush3.msra.mxu1 %v4236_v55 }
0x109a   :  { %3308 = vmatprep.subr.mxu1 %v3673_v0 }
0x109b   :  { %3309 = vmatpush3.msra.mxu1 %v4240_v23 }
0x109c   :  { %3311 = vmatmul.mubr.msk.f32.vlgmr.msra.gmra.mxu1 %vm217_vm2, %v1872_v18  ;;  %3332 = vmatprep.subr.mxu1 %v3673_v0 }
0x109d   :  { %3333 = vmatpush3.msra.mxu1 %v4335_v52  ;;  %3348 = vmatprep.mubr.msk.f32.mxu1 %vm3674_vm0, %v3673_v0 }
0x109e   :  { %3334 = vmatprep.subr.mxu1 %v3673_v0 }
0x109f   :  { %3335 = vmatpush3.msra.mxu1 %v4341_v20 }
0x10a0   :  { %3336 = vmatprep.subr.mxu1 %v3673_v0 }
0x10a1   :  { %3337 = vmatpush3.msra.mxu1 %v4345_v26 }
0x10a2   :  { %3338 = vmatprep.subr.mxu1 %v3673_v0 }
0x10a3   :  { %3339 = vmatpush3.msra.mxu1 %v4349_v21 }
0x10a4   :  { %3340 = vmatprep.subr.mxu1 %v3673_v0 }
0x10a5   :  { %3341 = vmatpush3.msra.mxu1 %v4353_v50 }
0x10a6   :  { %3342 = vmatprep.subr.mxu1 %v3673_v0 }
0x10a7   :  { %3343 = vmatpush3.msra.mxu1 %v4357_v22 }
0x10a8   :  { %3344 = vmatprep.subr.mxu1 %v3673_v0 }
0x10a9   :  { %3345 = vmatpush3.msra.mxu1 %v4361_v24 }
0x10aa   :  { %3346 = vmatprep.subr.mxu1 %v3673_v0 }
0x10ab   :  { %3347 = vmatpush3.msra.mxu1 %v4365_v25 }
0x10ac   :  { %3362 = vmatprep.subr.mxu1 %v3673_v0 }
0x1144   :  { %v1745_v32 = vpop.f32.mrf.mxu1 }
0x1145   :  { %v1746_v51 = vadd.f32 %v3994_v63, %v1745_v32 }
0x1146   :  { %v3252_v40 = vpop.f32.mrf.mxu1 }
0x1147   :  { %3531 = vtanh.f32 %v1746_v51  ;;  %v2781_v44 = vmul.f32 -1.442695, %v1746_v51 }
0x1154   :  { %v3532_v46 = vpop.eup %3531  ;;  %v1947_v47 = vpop.f32.mrf.mxu1 }
0x1155   :  { %v1948_v48 = vadd.f32 %v4267_v38, %v1947_v47  ;;  %1758 = vrot.lane.b32.xlu0 %v3532_v46, %s3675_s29 }
0x1156   :  { %v3282_v57 = vpop.f32.mrf.mxu1 }
0x1157   :  { %3533 = vtanh.f32 %v1948_v48  ;;  %v2785_v3 = vmul.f32 -1.442695, %v1948_v48 }
0x115c   :  { %v2149_v60 = vpop.f32.mrf.mxu1 }
0x115d   :  { %v2153_v12 = vadd.f32 %v2149_v60, %v188_v4 }
0x115e   :  { %v3312_v62 = vpop.f32.mrf.mxu1 }
0x115f   :  { %3535 = vtanh.f32 %v2153_v12  ;;  %v2789_v11 = vmul.f32 -1.442695, %v2153_v12 }
0x1160   :  { %3537 = vpow2.f32 %v2781_v44 }
0x1161   :  { %3539 = vpow2.f32 %v2785_v3 }
0x1164   :  { %v3534_v1 = vpop.eup %3533 }
0x1165   :  { %1960 = vrot.lane.b32.xlu1 %v3534_v1, %s3675_s29 }
0x116c   :  { %v3536_v63 = vpop.eup %3535 }
0x116d   :  { %2163 = vrot.lane.b32.xlu0 %v3536_v63, %s3675_s29  ;;  %v3538_v56 = vpop.eup %3537 }
0x116e   :  { %v1752_v8 = vadd.f32 1.0, %v3538_v56  ;;  %v3540_v54 = vpop.eup %3539 }
0x116f   :  { %v1954_v59 = vadd.f32 1.0, %v3540_v54 }
0x1170   :  { %3541 = vrcp.f32 %v1752_v8 }
0x1171   :  { %3543 = vpow2.f32 %v2789_v11 }
0x1172   :  { %3545 = vrcp.f32 %v1954_v59 }
0x117d   :  { %v3542_v28 = vpop.eup %3541 }
0x117e   :  { %v3544_v58 = vpop.eup %3543  ;;  %v1756_v27 = vmul.f32 %v3542_v28, %v4284_v9 }
0x117f   :  { %v2157_v13 = vadd.f32 1.0, %v3544_v58  ;;  %v3546_v61 = vpop.eup %3545 }
0x1180   :  { %v1958_v18 = vmul.f32 %v3546_v61, %v4288_v31 }
0x1181   :  { %3547 = vrcp.f32 %v2157_v13 }
0x118e   :  { %v3548_v30 = vpop.eup %3547 }
0x118f   :  { %v2161_v51 = vmul.f32 %v3548_v30, %v4293_v41 }
0x11c7   :  { %v1759_v33 = vpop.permute.xlu0 %1758 }
0x11c8   :  { %v1761_v2 = vmul.f32 %v3542_v28, %v1759_v33 }
0x11ca   :  { %1763 = vrot.lane.b32.xlu1 %v1761_v2, %s3675_s29 }
0x11d7   :  { %v1961_v14 = vpop.permute.xlu1 %1960 }
0x11d8   :  { %v1963_v29 = vmul.f32 %v3546_v61, %v1961_v14 }
0x11da   :  { %1965 = vrot.lane.b32.xlu0 %v1963_v29, %s3675_s29 }
0x11df   :  { %v2164_v15 = vpop.permute.xlu0 %2163 }
0x11e0   :  { %v2166_v34 = vmul.f32 %v3548_v30, %v2164_v15 }
0x11e2   :  { %2168 = vrot.lane.b32.xlu1 %v2166_v34, %s3675_s29 }
0x123c   :  { %v1764_v36 = vpop.permute.xlu1 %1763 }
0x123d   :  { %v4380_v42 = vadd.f32 %v1764_v36, %v1756_v27 }
0x123f   :  { %3549 = vtanh.f32 %v4380_v42 }
0x124c   :  { %v3550_v19 = vpop.eup %3549  ;;  %v1966_v10 = vpop.permute.xlu0 %1965 }
0x124d   :  { %v4384_v32 = vadd.f32 %v1966_v10, %v1958_v18  ;;  %1769 = vrot.lane.b32.xlu0 %v3550_v19, %s3675_s29 }
0x124f   :  { %3551 = vtanh.f32 %v4384_v32 }
0x1254   :  { %v2169_v40 = vpop.permute.xlu1 %2168 }
0x1255   :  { %v4389_v46 = vadd.f32 %v2169_v40, %v2161_v51 }
0x1257   :  { %3553 = vtanh.f32 %v4389_v46 }
0x125c   :  { %v3552_v9 = vpop.eup %3551 }
0x125d   :  { %1971 = vrot.lane.b32.xlu1 %v3552_v9, %s3675_s29 }
0x1264   :  { %v3554_v47 = vpop.eup %3553 }
0x1265   :  { %2174 = vrot.lane.b32.xlu0 %v3554_v47, %s3675_s29 }
0x12bf   :  { %v1770_v31 = vpop.permute.xlu0 %1769 }
0x12c0   :  { %v1772_v48 = vmul.f32 %v3542_v28, %v1770_v31 }
0x12c2   :  { %1980 = vrot.lane.b32.xlu0 %v1772_v48, %s3677_s25 }
0x12cf   :  { %v1972_v57 = vpop.permute.xlu1 %1971 }
0x12d0   :  { %v1974_v4 = vmul.f32 %v3546_v61, %v1972_v57 }
0x12d2   :  { %1976 = vrot.lane.b32.xlu1 %v1974_v4, %s3676_s0  ;;  %2182 = vrot.lane.b32.xlu0 %v1974_v4, %s3677_s25 }
0x12d7   :  { %v2175_v41 = vpop.permute.xlu0 %2174 }
0x12d8   :  { %v2177_v60 = vmul.f32 %v3548_v30, %v2175_v41 }
0x12da   :  { %2179 = vrot.lane.b32.xlu1 %v2177_v60, %s3676_s0 }
0x1334   :  { %v1981_v12 = vpop.permute.xlu0 %1980 }
0x1344   :  { %v1977_v62 = vpop.permute.xlu1 %1976  ;;  %v2183_v44 = vpop.permute.xlu0 %2182 }
0x1345   :  { %v1983_v1 = vsel %vm217_vm2, %v1977_v62, %v1981_v12 }
0x1346   :  { %3300 = vmatmul.mubr.msk.f32.vlgmr.msra.gmra.mxu0 %vm329_vm3, %v1983_v1 }
0x1347   :  { %3314 = vmatpush3.msra.mxu0 %v4190_v5  ;;  %3329 = vmatprep.mubr.msk.f32.mxu0 %vm3674_vm0, %v3673_v0 }
0x1348   :  { %3315 = vmatprep.subr.mxu0 %v3673_v0 }
0x1349   :  { %3316 = vmatpush3.msra.mxu0 %v4196_v6 }
0x134a   :  { %3317 = vmatprep.subr.mxu0 %v3673_v0 }
0x134b   :  { %3318 = vmatpush3.msra.mxu0 %v4200_v7 }
0x134c   :  { %3319 = vmatprep.subr.mxu0 %v3673_v0  ;;  %v2180_v63 = vpop.permute.xlu1 %2179 }
0x134d   :  { %3320 = vmatpush3.msra.mxu0 %v4204_v35  ;;  %v2185_v3 = vsel %vm217_vm2, %v2180_v63, %v2183_v44 }
0x134e   :  { %3321 = vmatprep.subr.mxu0 %v3673_v0 }
0x134f   :  { %3322 = vmatpush3.msra.mxu0 %v4208_v37 }
0x1350   :  { %3323 = vmatprep.subr.mxu0 %v3673_v0 }
0x1351   :  { %3324 = vmatpush3.msra.mxu0 %v4212_v39 }
0x1352   :  { %3325 = vmatprep.subr.mxu0 %v3673_v0 }
0x1353   :  { %3326 = vmatpush3.msra.mxu0 %v4216_v43 }
0x1354   :  { %3327 = vmatprep.subr.mxu0 %v3673_v0 }
0x1355   :  { %3328 = vmatpush3.msra.mxu0 %v4221_v49 }
0x1356   :  { %3330 = vmatmul.mubr.msk.f32.vlgmr.msra.gmra.mxu0 %vm329_vm3, %v2185_v3  ;;  %3351 = vmatprep.subr.mxu0 %v3673_v0 }
0x1357   :  { %3352 = vmatpush3.msra.mxu0 %v4226_v16  ;;  %3359 = vmatprep.mubr.msk.f32.mxu0 %vm3674_vm0, %v3673_v0 }
0x1358   :  { %3353 = vmatprep.subr.mxu0 %v3673_v0 }
0x1359   :  { %3354 = vmatpush3.msra.mxu0 %v4232_v17  ;;  %v4451_v17 = vld [vmem:[%s4530_s3 + $0x2] ss:$0 sm:$0xff] }
0x135a   :  { %3355 = vmatprep.subr.mxu0 %v3673_v0 }
0x135b   :  { %3356 = vmatpush3.msra.mxu0 %v4236_v55 }
0x135c   :  { %3357 = vmatprep.subr.mxu0 %v3673_v0 }
0x135d   :  { %3358 = vmatpush3.msra.mxu0 %v4240_v23 }
0x135e   :  { %3360 = vmatmul.mubr.msk.f32.vlgmr.msra.gmra.mxu0 %vm217_vm2, %v2180_v63  ;;  %3381 = vmatprep.subr.mxu0 %v3673_v0 }
0x135f   :  { %3382 = vmatpush3.msra.mxu0 %v4335_v52  ;;  %3397 = vmatprep.mubr.msk.f32.mxu0 %vm3674_vm0, %v3673_v0 }
0x1360   :  { %3383 = vmatprep.subr.mxu0 %v3673_v0 }
0x1361   :  { %3384 = vmatpush3.msra.mxu0 %v4341_v20 }
0x1362   :  { %3385 = vmatprep.subr.mxu0 %v3673_v0 }
0x1363   :  { %3386 = vmatpush3.msra.mxu0 %v4345_v26 }
0x1364   :  { %3387 = vmatprep.subr.mxu0 %v3673_v0 }
0x1365   :  { %3388 = vmatpush3.msra.mxu0 %v4349_v21 }
0x1366   :  { %3389 = vmatprep.subr.mxu0 %v3673_v0 }
0x1367   :  { %3390 = vmatpush3.msra.mxu0 %v4353_v50  ;;  %v193_v50 = vadd.f32 %v4274_v45, %v3846_v53 }
0x1368   :  { %3391 = vmatprep.subr.mxu0 %v3673_v0 }
0x1369   :  { %3392 = vmatpush3.msra.mxu0 %v4357_v22 }
0x136a   :  { %3393 = vmatprep.subr.mxu0 %v3673_v0 }
0x136b   :  { %3394 = vmatpush3.msra.mxu0 %v4361_v24 }
0x136c   :  { %3395 = vmatprep.subr.mxu0 %v3673_v0 }
0x136d   :  { %3396 = vmatpush3.msra.mxu0 %v4365_v25 }
0x1406   :  { %v2053_v16 = vpop.f32.mrf.mxu0 }
0x1407   :  { %v2054_v55 = vadd.f32 %v4451_v17, %v2053_v16 }
0x1408   :  { %v3301_v23 = vpop.f32.mrf.mxu0 }
0x1409   :  { %3555 = vtanh.f32 %v2054_v55  ;;  %v2787_v11 = vmul.f32 -1.442695, %v2054_v55 }
0x1416   :  { %v3556_v52 = vpop.eup %3555  ;;  %v2255_v20 = vpop.f32.mrf.mxu0 }
0x1417   :  { %v2256_v26 = vadd.f32 %v4267_v38, %v2255_v20  ;;  %2066 = vrot.lane.b32.xlu1 %v3556_v52, %s3675_s29 }
0x1418   :  { %v3331_v21 = vpop.f32.mrf.mxu0 }
0x1419   :  { %3557 = vtanh.f32 %v2256_v26  ;;  %v2791_v54 = vmul.f32 -1.442695, %v2256_v26 }
0x141e   :  { %v2457_v22 = vpop.f32.mrf.mxu0 }
0x141f   :  { %v2461_v24 = vadd.f32 %v2457_v22, %v193_v50 }
0x1420   :  { %v3361_v25 = vpop.f32.mrf.mxu0 }
0x1421   :  { %3559 = vtanh.f32 %v2461_v24  ;;  %v2795_v33 = vmul.f32 -1.442695, %v2461_v24 }
0x1422   :  { %3561 = vpow2.f32 %v2787_v11 }
0x1423   :  { %3563 = vpow2.f32 %v2791_v54 }
0x1426   :  { %v3558_v56 = vpop.eup %3557 }
0x1427   :  { %2268 = vrot.lane.b32.xlu0 %v3558_v56, %s3675_s29 }
0x142e   :  { %v3560_v8 = vpop.eup %3559 }
0x142f   :  { %2471 = vrot.lane.b32.xlu1 %v3560_v8, %s3675_s29  ;;  %v3562_v59 = vpop.eup %3561 }
0x1430   :  { %v2060_v28 = vadd.f32 1.0, %v3562_v59  ;;  %v3564_v53 = vpop.eup %3563 }
0x1431   :  { %v2262_v45 = vadd.f32 1.0, %v3564_v53 }
0x1432   :  { %3565 = vrcp.f32 %v2060_v28 }
0x1433   :  { %3567 = vpow2.f32 %v2795_v33 }
0x1434   :  { %3569 = vrcp.f32 %v2262_v45 }
0x143f   :  { %v3566_v2 = vpop.eup %3565 }
0x1440   :  { %v3568_v61 = vpop.eup %3567  ;;  %v2064_v18 = vmul.f32 %v3566_v2, %v4380_v42 }
0x1441   :  { %v2465_v14 = vadd.f32 1.0, %v3568_v61  ;;  %v3570_v29 = vpop.eup %3569 }
0x1442   :  { %v2266_v51 = vmul.f32 %v3570_v29, %v4384_v32 }
0x1443   :  { %3571 = vrcp.f32 %v2465_v14 }
0x1450   :  { %v3572_v34 = vpop.eup %3571 }
0x1451   :  { %v2469_v31 = vmul.f32 %v3572_v34, %v4389_v46 }
0x1489   :  { %v2067_v58 = vpop.permute.xlu1 %2066 }
0x148a   :  { %v2069_v13 = vmul.f32 %v3566_v2, %v2067_v58 }
0x148c   :  { %2071 = vrot.lane.b32.xlu0 %v2069_v13, %s3675_s29 }
0x1499   :  { %v2269_v30 = vpop.permute.xlu0 %2268 }
0x149a   :  { %v2271_v15 = vmul.f32 %v3570_v29, %v2269_v30 }
0x149c   :  { %2273 = vrot.lane.b32.xlu1 %v2271_v15, %s3675_s29 }
0x14a1   :  { %v2472_v27 = vpop.permute.xlu1 %2471 }
0x14a2   :  { %v2474_v36 = vmul.f32 %v3572_v34, %v2472_v27 }
0x14a4   :  { %2476 = vrot.lane.b32.xlu0 %v2474_v36, %s3675_s29 }
0x14fe   :  { %v2072_v19 = vpop.permute.xlu0 %2071 }
0x14ff   :  { %v4464_v10 = vadd.f32 %v2072_v19, %v2064_v18 }
0x1501   :  { %3573 = vtanh.f32 %v4464_v10 }
0x150e   :  { %v3574_v40 = vpop.eup %3573  ;;  %v2274_v9 = vpop.permute.xlu1 %2273 }
0x150f   :  { %v4468_v47 = vadd.f32 %v2274_v9, %v2266_v51  ;;  %2077 = vrot.lane.b32.xlu1 %v3574_v40, %s3675_s29 }
0x1511   :  { %3575 = vtanh.f32 %v4468_v47 }
0x1516   :  { %v2477_v48 = vpop.permute.xlu0 %2476 }
0x1517   :  { %v2479_v57 = vadd.f32 %v2477_v48, %v2469_v31 }
0x1519   :  { %3577 = vtanh.f32 %v2479_v57 }
0x151e   :  { %v3576_v42 = vpop.eup %3575 }
0x151f   :  { %2279 = vrot.lane.b32.xlu0 %v3576_v42, %s3675_s29 }
0x1526   :  { %v3578_v4 = vpop.eup %3577 }
0x1527   :  { %2482 = vrot.lane.b32.xlu1 %v3578_v4, %s3675_s29 }
0x1581   :  { %v2078_v32 = vpop.permute.xlu1 %2077 }
0x1582   :  { %v2080_v41 = vmul.f32 %v3566_v2, %v2078_v32 }
0x1584   :  { %2288 = vrot.lane.b32.xlu1 %v2080_v41, %s3677_s25 }
0x1591   :  { %v2280_v60 = vpop.permute.xlu0 %2279 }
0x1592   :  { %v2282_v12 = vmul.f32 %v3570_v29, %v2280_v60 }
0x1594   :  { %2284 = vrot.lane.b32.xlu0 %v2282_v12, %s3676_s0  ;;  %2490 = vrot.lane.b32.xlu1 %v2282_v12, %s3677_s25 }
0x1599   :  { %v2483_v46 = vpop.permute.xlu1 %2482 }
0x159a   :  { %v2485_v62 = vmul.f32 %v3572_v34, %v2483_v46  ;;  %v3678_v46 = vmov 32  }
0x159b   :  { %3410 = vset.pattern.permute.xlu0 %v3678_v46 }
0x159c   :  { %2487 = vrot.lane.b32.xlu0 %v2485_v62, %s3676_s0 }
0x15f6   :  { %v2289_v1 = vpop.permute.xlu1 %2288 }
0x1606   :  { %v2285_v63 = vpop.permute.xlu0 %2284 }
0x1607   :  { %v2291_v44 = vsel %vm217_vm2, %v2285_v63, %v2289_v1 }
0x1608   :  { %3349 = vmatmul.mubr.msk.f32.vlgmr.msra.gmra.mxu1 %vm329_vm3, %v2291_v44 }
0x1609   :  { %3363 = vmatpush3.msra.mxu1 %v4190_v5  ;;  %3378 = vmatprep.mubr.msk.f32.mxu1 %vm3674_vm0, %v3673_v0 }
0x160a   :  { %3364 = vmatprep.subr.mxu1 %v3673_v0 }
0x160b   :  { %3365 = vmatpush3.msra.mxu1 %v4196_v6  ;;  %v2491_v6 = vpop.permute.xlu1 %2490 }
0x160c   :  { %3366 = vmatprep.subr.mxu1 %v3673_v0 }
0x160d   :  { %3367 = vmatpush3.msra.mxu1 %v4200_v7 }
0x160e   :  { %3368 = vmatprep.subr.mxu1 %v3673_v0  ;;  %v2488_v5 = vpop.permute.xlu0 %2487 }
0x160f   :  { %3369 = vmatpush3.msra.mxu1 %v4204_v35  ;;  %v2493_v7 = vsel %vm217_vm2, %v2488_v5, %v2491_v6 }
0x1610   :  { %3370 = vmatprep.subr.mxu1 %v3673_v0 }
0x1611   :  { %3371 = vmatpush3.msra.mxu1 %v4208_v37 }
0x1612   :  { %3372 = vmatprep.subr.mxu1 %v3673_v0 }
0x1613   :  { %3373 = vmatpush3.msra.mxu1 %v4212_v39 }
0x1614   :  { %3374 = vmatprep.subr.mxu1 %v3673_v0 }
0x1615   :  { %3375 = vmatpush3.msra.mxu1 %v4216_v43 }
0x1616   :  { %3376 = vmatprep.subr.mxu1 %v3673_v0 }
0x1617   :  { %3377 = vmatpush3.msra.mxu1 %v4221_v49 }
0x1618   :  { %3379 = vmatmul.mubr.msk.f32.vlgmr.msra.gmra.mxu1 %vm329_vm3, %v2493_v7 }
0x16c8   :  { %v2361_v35 = vpop.f32.mrf.mxu1 }
0x16c9   :  { %v2362_v37 = vadd.f32 %v4451_v17, %v2361_v35 }
0x16ca   :  { %v3350_v3 = vpop.f32.mrf.mxu1 }
0x16cb   :  { %3579 = vtanh.f32 %v2362_v37  ;;  %v2793_v23 = vmul.f32 -1.442695, %v2362_v37 }
0x16d8   :  { %v3580_v39 = vpop.eup %3579  ;;  %v2563_v16 = vpop.f32.mrf.mxu1 }
0x16d9   :  { %v2564_v55 = vadd.f32 %v4267_v38, %v2563_v16  ;;  %2374 = vrot.lane.b32.xlu0 %v3580_v39, %s3675_s29 }
0x16da   :  { %v3380_v43 = vpop.f32.mrf.mxu1 }
0x16db   :  { %3581 = vtanh.f32 %v2564_v55  ;;  %v2797_v49 = vmul.f32 -1.442695, %v2564_v55 }
0x16dc   :  { %3583 = vpow2.f32 %v2793_v23 }
0x16dd   :  { %3585 = vpow2.f32 %v2797_v49 }
0x16e8   :  { %v3582_v0 = vpop.eup %3581 }
0x16e9   :  { %2576 = vrot.lane.b32.xlu1 %v3582_v0, %s3675_s29  ;;  %v3584_v52 = vpop.eup %3583 }
0x16ea   :  { %v2368_v20 = vadd.f32 1.0, %v3584_v52  ;;  %v3586_v26 = vpop.eup %3585 }
0x16eb   :  { %v2570_v21 = vadd.f32 1.0, %v3586_v26 }
0x16ec   :  { %3587 = vrcp.f32 %v2368_v20 }
0x16ed   :  { %3589 = vrcp.f32 %v2570_v21 }
0x16f9   :  { %v3588_v50 = vpop.eup %3587 }
0x16fa   :  { %v3590_v38 = vpop.eup %3589  ;;  %v2372_v8 = vmul.f32 %v3588_v50, %v4464_v10 }
0x16fb   :  { %v2574_v59 = vmul.f32 %v3590_v38, %v4468_v47  ;;  %v2800_v47 = vld [vmem:[%s4530_s3 + $0x3] ss:$0 sm:$0xff]  ;;  %s3679_s3 = smov [#allocation5]  }
0x16fc   :  { %s2727_s12 = sshll.u32 %s3679_s3, 4  ;;  %s2728_s12 = int_to_ptr.vmem [resolvable:$true] %s2727_s12 }
0x16fd   :  { %p3651_p6 = scmp.lt.s32.totalorder %s2728_s12, %s2728_s12 }
0x174b   :  { %v2375_v22 = vpop.permute.xlu0 %2374 }
0x174c   :  { %v2377_v24 = vmul.f32 %v3588_v50, %v2375_v22 }
0x174e   :  { %2379 = vrot.lane.b32.xlu0 %v2377_v24, %s3675_s29 }
0x175b   :  { %v2577_v25 = vpop.permute.xlu1 %2576 }
0x175c   :  { %v2579_v56 = vmul.f32 %v3590_v38, %v2577_v25 }
0x175e   :  { %2581 = vrot.lane.b32.xlu1 %v2579_v56, %s3675_s29 }
0x17c0   :  { %v2380_v11 = vpop.permute.xlu0 %2379 }
0x17c1   :  { %v2382_v54 = vadd.f32 %v2380_v11, %v2372_v8 }
0x17c3   :  { %3591 = vtanh.f32 %v2382_v54 }
0x17d0   :  { %v3592_v28 = vpop.eup %3591  ;;  %v2582_v33 = vpop.permute.xlu1 %2581 }
0x17d1   :  { %v2584_v53 = vadd.f32 %v2582_v33, %v2574_v59  ;;  %2385 = vrot.lane.b32.xlu0 %v3592_v28, %s3675_s29 }
0x17d3   :  { %3593 = vtanh.f32 %v2584_v53 }
0x17e0   :  { %v3594_v45 = vpop.eup %3593 }
0x17e1   :  { %2587 = vrot.lane.b32.xlu1 %v3594_v45, %s3675_s29 }
0x1843   :  { %v2386_v2 = vpop.permute.xlu0 %2385 }
0x1844   :  { %v2388_v58 = vmul.f32 %v3588_v50, %v2386_v2 }
0x1846   :  { %2596 = vrot.lane.b32.xlu1 %v2388_v58, %s3677_s25 }
0x1853   :  { %v2588_v13 = vpop.permute.xlu1 %2587 }
0x1854   :  { %v2590_v61 = vmul.f32 %v3590_v38, %v2588_v13 }
0x1856   :  { %2592 = vrot.lane.b32.xlu0 %v2590_v61, %s3676_s0 }
0x18b8   :  { %v2597_v14 = vpop.permute.xlu1 %2596 }
0x18c8   :  { %v2593_v29 = vpop.permute.xlu0 %2592 }
0x18c9   :  { %v2599_v30 = vsel %vm217_vm2, %v2593_v29, %v2597_v14 }
0x18ca   :  { %3398 = vmatmul.mubr.msk.f32.vlgmr.msra.gmra.mxu0 %vm329_vm3, %v2599_v30 }
0x198a   :  { %v2669_v15 = vpop.f32.mrf.mxu0 }
0x198b   :  { %v2670_v34 = vadd.f32 %v4451_v17, %v2669_v15 }
0x198c   :  { %v3399_v27 = vpop.f32.mrf.mxu0 }
0x198d   :  { %3595 = vtanh.f32 %v2670_v34  ;;  %v2799_v18 = vmul.f32 -1.442695, %v2670_v34 }
0x198f   :  { %3597 = vpow2.f32 %v2799_v18 }
0x199a   :  { %v3596_v36 = vpop.eup %3595 }
0x199b   :  { %2682 = vrot.lane.b32.xlu0 %v3596_v36, %s3675_s29 }
0x199c   :  { %v3598_v19 = vpop.eup %3597 }
0x199d   :  { %v2676_v10 = vadd.f32 1.0, %v3598_v19 }
0x199f   :  { %3599 = vrcp.f32 %v2676_v10 }
0x19ac   :  { %v3600_v51 = vpop.eup %3599 }
0x19ad   :  { %v2680_v17 = vmul.f32 %v3600_v51, %v2382_v54 }
0x1a0d   :  { %v2683_v40 = vpop.permute.xlu0 %2682 }
0x1a0e   :  { %v2685_v9 = vmul.f32 %v3600_v51, %v2683_v40 }
0x1a10   :  { %2687 = vrot.lane.b32.xlu1 %v2685_v9, %s3675_s29 }
0x1a14   :  { %2703 = vrot.lane.b32.xlu1 %v2800_v47, %s3676_s0 }
0x1a82   :  { %v2688_v31 = vpop.permute.xlu1 %2687 }
0x1a83   :  { %v2690_v48 = vadd.f32 %v2688_v31, %v2680_v17 }
0x1a85   :  { %3601 = vtanh.f32 %v2690_v48 }
0x1a86   :  { %v2704_v4 = vpop.permute.xlu1 %2703 }
0x1a92   :  { %v3602_v57 = vpop.eup %3601 }
0x1a93   :  { %2693 = vrot.lane.b32.xlu0 %v3602_v57, %s3675_s29  ;;  %s3646_s29 = scalar_lea.vmem %s2728_s12, 128 }
0x1a94   :  { %p3647_p5 = scmp.ne.s32.totalorder %s2728_s12, %s3646_s29  ;;  %p3652_p7 = scmp.lt.s32.totalorder %s3646_s29, %s3646_s29 }
0x1a96   :  { %p3653_p8 = por %p3652_p7, %p3651_p6 }
0x1a98   :  { %p3654_p9 = pnand %p3653_p8, %p3647_p5 }
0x1b05   :  { %v2694_v42 = vpop.permute.xlu0 %2693 }
0x1b06   :  { %v2696_v32 = vmul.f32 %v3600_v51, %v2694_v42 }
0x1b08   :  { %v2706_v41 = vmul.f32 %v2704_v4, %v2696_v32 }
0x1b0a   :  { %2708 = vrot.lane.b32.xlu0 %v2706_v41, %s3676_s0 }
0x1b7c   :  { %v2709_v60 = vpop.permute.xlu0 %2708 }
0x1b7d   :  { %v2711_v12 = vsel %vm217_vm2, %v2709_v60, 0.0 }
0x1b7e   :  { %2712 = vadd.xlane.f32.xlu1 %v2711_v12 }
0x1c07   :  { %v2713_v62 = vpop.xlane.xlu1 %2712 }
0x1c08   :  { %v2714_v1 = vadd.f32 %v2800_v47, %v2713_v62 }
0x1c0a   :  { %2717 = vperm.xlu0 %3410, %v2714_v1  }
0x1c85   :  { %v2718_v63 = vpop.permute.xlu0 %2717 }
0x1c86   :  { %2720 = vst [vmem:[#allocation5] sm:$0xff] %v2718_v63 }
0x1c87   :  { %3657 = shalt.err (!%p3654_p9)
}
0x1c88   :  { %2730 = dma.vmem_to_hbm [thread:$0]  %s2728_s12, 128, %s4531_s4, [#allocation4]  }
0x1c89   :  { %3668 = dma.done.wait [#allocation4], 128  }
0x1c8a   :  { %3669 = vsyncadd [#allocation4], 4294967168 }
0x1c8b   :  { %2734 = vsyncpa [#allocation3], 1 }
0x1c8c   :  { %2735 = vsyncpa [#allocation4], 1 }

</bundles_post_ra>
